<compile_context>
chip_gen: v7x
topology: tpu7x:2x2x1
jax: 0.10.0
libtpu: 0.0.40
codegen_flags: <defaults>
</compile_context>

<pallas_src>
import functools

import jax
import jax.numpy as jnp
from jax import lax
from jax.experimental import pallas as pl
from jax.experimental.pallas import tpu as pltpu

LEAKY_SLOPE = 0.01
GN_EPS = 1e-5
LANE = 128


def _round_up(x, m):
    return ((x + m - 1) // m) * m


# ----------------------------- kernel helpers ------------------------------ #
def _gn_lrelu_packed(y, gamma, beta, *, lane, lo_seg, l_out, b_tile, n_valid):
    """GroupNorm(num_groups=1) + LeakyReLU over a lane-packed slab.

    y: (C_pad, W) f32 with W = b_tile * lo_seg.  Sample b occupies lanes
    [b*lo_seg, (b+1)*lo_seg); only the first l_out columns of each segment are
    valid and enter the statistics.  Padded channel rows are zero and carry
    zero gamma/beta, so they contribute nothing and stay zero.
    """
    col = lax.broadcasted_iota(jnp.int32, (1, lo_seg), 1)
    col_valid = col < l_out
    inv_n = 1.0 / float(n_valid)
    mean_vec = jnp.zeros((1, y.shape[1]), jnp.float32)
    rstd_vec = jnp.zeros((1, y.shape[1]), jnp.float32)
    for b in range(b_tile):                              # static, small
        seg = y[:, b * lo_seg:(b + 1) * lo_seg]          # 128-aligned lane slice
        segm = jnp.where(col_valid, seg, 0.0)
        s = jnp.sum(segm)
        ss = jnp.sum(segm * segm)
        mean = s * inv_n
        var = jnp.maximum(ss * inv_n - mean * mean, 0.0)  # clamp (review note)
        rstd = lax.rsqrt(var + GN_EPS)
        in_seg = (lane >= b * lo_seg) & (lane < (b + 1) * lo_seg)
        mean_vec = mean_vec + jnp.where(in_seg, mean, 0.0)
        rstd_vec = rstd_vec + jnp.where(in_seg, rstd, 0.0)
    yn = (y - mean_vec) * rstd_vec * gamma + beta
    return jnp.where(yn > 0, yn, LEAKY_SLOPE * yn)


# --------------------------------- kernel ----------------------------------- #
def block_kernel(x_ref, w1_ref, w2_ref, wr_ref, pv_ref, out_ref, *,
                 K, stride, l_out, lo_seg, b_tile, e_true, c_out_true,
                 c_out_p):
    W = out_ref.shape[-1]                      # = b_tile * lo_seg (128 mult)
    x = x_ref[...]                             # (stride, C_in_p, W)  mxu dtype
    w1 = w1_ref[...]                           # (K, E_p, C_in_p)
    w2 = w2_ref[...]                           # (3, C_out_p, E_p)
    wr = wr_ref[...]                           # (K, C_out_p, C_in_p)
    pv = pv_ref[...]                           # (E_p, 8) f32  packed params
    b1, g1, be1 = pv[:, 0:1], pv[:, 1:2], pv[:, 2:3]
    b2 = pv[:c_out_p, 3:4]
    br = pv[:c_out_p, 4:5]
    g2 = pv[:c_out_p, 5:6]
    be2 = pv[:c_out_p, 6:7]

    lane = lax.broadcasted_iota(jnp.int32, (1, W), 1)
    valid = (lane >= 0) & (lane < l_out)       # valid columns of segment 0
    for b in range(1, b_tile):
        valid = valid | ((lane >= b * lo_seg) & (lane < b * lo_seg + l_out))

    # --- first conv (Cin->E) and residual conv (Cin->Cout): per-tap MXU
    # accumulation over shared rolled phase slabs (no im2col slab in VMEM).
    h = None
    r = None
    for k in range(K):                         # static, tiny
        ph, off = k % stride, k // stride
        xk = x[ph]
        if off:
            xk = pltpu.roll(xk, (-off) % W, axis=1)   # XLU, off VALU path
        hk = jnp.dot(w1[k], xk, preferred_element_type=jnp.float32)
        rk = jnp.dot(wr[k], xk, preferred_element_type=jnp.float32)
        h = hk if h is None else h + hk
        r = rk if r is None else r + rk
    h = h + b1                                 # (E_p, W) f32
    r = r + br                                 # (C_out_p, W) f32

    # --- GroupNorm(1, E) + LeakyReLU per sample; zero pad/garbage columns so
    # they act as the second conv's zero padding across segment boundaries.
    h = _gn_lrelu_packed(h, g1, be1, lane=lane, lo_seg=lo_seg, l_out=l_out,
                         b_tile=b_tile, n_valid=e_true * l_out)
    h = jnp.where(valid, h, 0.0)
    hm = h.astype(x.dtype)                     # mxu dtype for second conv

    # --- second conv: kernel 3, stride 1, pad 1, via lane rolls (boundary
    # columns are already zero, so no concatenates / VMEM scratch needed).
    y = jnp.dot(w2[1], hm, preferred_element_type=jnp.float32)
    y = y + jnp.dot(w2[0], pltpu.roll(hm, 1, axis=1),
                    preferred_element_type=jnp.float32)
    y = y + jnp.dot(w2[2], pltpu.roll(hm, W - 1, axis=1),
                    preferred_element_type=jnp.float32)
    y = y + b2 + r

    # --- out: GroupNorm(1, C_out) + LeakyReLU, lane-dense store.
    y = _gn_lrelu_packed(y, g2, be2, lane=lane, lo_seg=lo_seg, l_out=l_out,
                         b_tile=b_tile, n_valid=c_out_true * l_out)
    out_ref[...] = y.astype(out_ref.dtype)


# -------------------------------- wrapper ----------------------------------- #
def block_forward(x, params, *, kernel_size, stride, padding,
                  mxu_dtype=jnp.bfloat16, out_dtype=jnp.float32,
                  target_lanes=512):
    """x: (N, C_in, L) float32, PyTorch NCL layout. Returns (N, C_out, L_out).

    mxu_dtype controls the matmul operand dtype (f32 accumulation always);
    out_dtype controls the kernel writeback dtype (bf16 halves HBM store
    traffic).  GroupNorm / LeakyReLU / residual math is always f32.
    """
    N, C_in, L = x.shape
    K, S, P = kernel_size, stride, padding
    E = params["w1"].shape[0]
    C_out = params["w2"].shape[0]
    L_out = (L + 2 * P - K) // S + 1
    L_pad = L + 2 * P

    sub = 16 if mxu_dtype == jnp.bfloat16 else 8     # sublane multiple
    C_in_p = _round_up(C_in, sub)
    E_p = _round_up(E, sub)
    C_out_p = _round_up(C_out, sub)

    max_off = (K - 1) // S
    lo_seg = _round_up(max(L_out + 1, L_out + max_off, -(-L_pad // S)), LANE)

    # B_TILE: widen matmul/store lanes toward ~target_lanes, keep >=2 grid
    # steps when N > 1 so both TensorCores get work (megacore / v7x).
    b_tile = max(1, min(N, target_lanes // lo_seg))
    if N > 1:
        b_tile = min(b_tile, -(-N // 2))
    n_pad = _round_up(N, b_tile)
    grid = n_pad // b_tile
    W = b_tile * lo_seg

    # ---- input: NCL -> phase-decimated, channel-padded, lane-packed slab of
    # shape (stride, C_in_p, n_pad * lo_seg).  Phase decimation makes every
    # conv tap a contiguous (rolled) lane slab even for stride > 1.
    xp = jnp.pad(x.astype(jnp.float32),
                 ((0, n_pad - N), (0, C_in_p - C_in),
                  (P, S * lo_seg - L_pad + P)))
    xp = xp.reshape(n_pad, C_in_p, lo_seg, S)
    xp = jnp.transpose(xp, (3, 1, 0, 2)).reshape(S, C_in_p, n_pad * lo_seg)
    xp = xp.astype(mxu_dtype)

    # PyTorch conv weight (O, I, K) -> per-tap (K, O_pad, I_pad), zero padded.
    def fold(w, o_p, i_p):
        O, I, _ = w.shape
        wt = jnp.transpose(w, (2, 0, 1))
        wt = jnp.pad(wt, ((0, 0), (0, o_p - O), (0, i_p - I)))
        return wt.astype(mxu_dtype)

    w1 = fold(params["w1"], E_p, C_in_p)       # (K, E_p, C_in_p)
    w2 = fold(params["w2"], C_out_p, E_p)      # (3, C_out_p, E_p)
    wr = fold(params["wr"], C_out_p, C_in_p)   # (K, C_out_p, C_in_p)

    # Pack the 7 per-channel vectors into one resident f32 array (E_p, 8).
    def col(v):
        v = v.astype(jnp.float32)
        return jnp.pad(v, (0, E_p - v.shape[0])).reshape(E_p, 1)

    pvec = jnp.concatenate(
        [col(params["b1"]), col(params["g1"]), col(params["be1"]),
         col(params["b2"]), col(params["br"]), col(params["g2"]),
         col(params["be2"]), jnp.zeros((E_p, 1), jnp.float32)], axis=1)

    kern = functools.partial(
        block_kernel, K=K, stride=S, l_out=L_out, lo_seg=lo_seg,
        b_tile=b_tile, e_true=E, c_out_true=C_out, c_out_p=C_out_p)

    x_spec = pl.BlockSpec((S, C_in_p, W), lambda i: (0, 0, i))
    out_spec = pl.BlockSpec((C_out_p, W), lambda i: (0, i))

    def resident(shape):
        nd = len(shape)
        return pl.BlockSpec(shape, lambda i, _nd=nd: (0,) * _nd)

    # Rough per-step VMEM estimate (double-buffered blocks + resident weights +
    # f32 intermediates); clamp well under v7x's 64 MiB physical VMEM.
    mxu_b = jnp.dtype(mxu_dtype).itemsize
    out_b = jnp.dtype(out_dtype).itemsize
    est = (2 * (S * C_in_p * W * mxu_b + C_out_p * W * out_b)
           + 2 * (K * E_p * C_in_p + K * C_out_p * C_in_p
                  + 3 * C_out_p * E_p) * mxu_b
           + (2 * E_p + 4 * C_out_p) * W * 4 + E_p * 8 * 4 * 2)
    vmem_limit = int(min(48 * 2**20, max(16 * 2**20, 4 * est)))

    # TODO(synk): single-buffer the resident weight/param inputs once
    # pipeline_mode=pl.Buffered(1) is verified on all target chips.
    out2d = pl.pallas_call(
        kern,
        out_shape=jax.ShapeDtypeStruct((C_out_p, n_pad * lo_seg), out_dtype),
        grid_spec=pltpu.PrefetchScalarGridSpec(
            num_scalar_prefetch=0,
            grid=(grid,),
            in_specs=[x_spec,
                      resident((K, E_p, C_in_p)),
                      resident((3, C_out_p, E_p)),
                      resident((K, C_out_p, C_in_p)),
                      resident((E_p, 8))],
            out_specs=out_spec),
        compiler_params=pltpu.CompilerParams(
            dimension_semantics=("parallel",),     # batch tiles -> megacore
            vmem_limit_bytes=vmem_limit),
    )(xp, w1, w2, wr, pvec)

    out = out2d.reshape(C_out_p, n_pad, lo_seg)[:C_out, :N, :L_out]
    return jnp.transpose(out, (1, 0, 2))            # (N, C_out, L_out)


# --------------------------- pure-JAX reference ------------------------------ #
def block_reference(x, params, *, kernel_size, stride, padding):
    def conv1d(x, w, b, s, p):
        y = lax.conv_general_dilated(
            x, w, window_strides=(s,), padding=[(p, p)],
            dimension_numbers=("NCH", "OIH", "NCH"))
        return y + b[None, :, None]

    def gn_lrelu(y, g, b):
        mean = jnp.mean(y, axis=(1, 2), keepdims=True)
        var = jnp.mean((y - mean) ** 2, axis=(1, 2), keepdims=True)
        yn = (y - mean) / jnp.sqrt(var + GN_EPS)
        yn = yn * g[None, :, None] + b[None, :, None]
        return jnp.where(yn > 0, yn, LEAKY_SLOPE * yn)

    h = conv1d(x, params["w1"], params["b1"], stride, padding)
    h = gn_lrelu(h, params["g1"], params["be1"])
    h = conv1d(h, params["w2"], params["b2"], 1, 1)
    r = conv1d(x, params["wr"], params["br"], stride, padding)
    return gn_lrelu(r + h, params["g2"], params["be2"])


# ---------------------------------- main ------------------------------------ #
if __name__ == "__main__":
    # Small shapes consistent with the module; N=5 exercises multi-sample
    # lane packing (B_TILE > 1) and a zero-padded batch tail.
    N, C_in, C_out, L = 5, 4, 8, 16
    kernel_size, padding = 3, 1
    E = max(C_in, C_out)

    key = jax.random.PRNGKey(0)
    ks = jax.random.split(key, 8)
    params = {
        "w1": 0.1 * jax.random.normal(ks[0], (E, C_in, kernel_size), jnp.float32),
        "b1": 0.1 * jax.random.normal(ks[1], (E,), jnp.float32),
        "g1": jnp.ones((E,), jnp.float32),
        "be1": jnp.zeros((E,), jnp.float32),
        "w2": 0.1 * jax.random.normal(ks[2], (C_out, E, 3), jnp.float32),
        "b2": 0.1 * jax.random.normal(ks[3], (C_out,), jnp.float32),
        "wr": 0.1 * jax.random.normal(ks[4], (C_out, C_in, kernel_size), jnp.float32),
        "br": 0.1 * jax.random.normal(ks[5], (C_out,), jnp.float32),
        "g2": jnp.ones((C_out,), jnp.float32),
        "be2": jnp.zeros((C_out,), jnp.float32),
    }

    x = jax.random.normal(ks[6], (N, C_in, L), jnp.float32)

    for stride in (1, 2):
        L_out = (L + 2 * padding - kernel_size) // stride + 1
        y_ref = jax.block_until_ready(
            block_reference(x, params, kernel_size=kernel_size, stride=stride,
                            padding=padding))

        # 1) exact-semantics run: f32 MXU operands, f32 output.
        y_f32 = jax.block_until_ready(
            block_forward(x, params, kernel_size=kernel_size, stride=stride,
                          padding=padding, mxu_dtype=jnp.float32,
                          out_dtype=jnp.float32))
        assert y_f32.shape == y_ref.shape == (N, C_out, L_out)
        assert jnp.allclose(y_f32, y_ref, atol=1e-4, rtol=1e-4), (
            f"stride={stride} f32 max abs err "
            f"{jnp.max(jnp.abs(y_f32 - y_ref))}")

        # 2) performance variant: bf16 MXU operands + bf16 writeback.
        y_bf16 = jax.block_until_ready(
            block_forward(x, params, kernel_size=kernel_size, stride=stride,
                          padding=padding, mxu_dtype=jnp.bfloat16,
                          out_dtype=jnp.bfloat16))
        assert y_bf16.shape == y_ref.shape
        assert jnp.allclose(y_bf16.astype(jnp.float32), y_ref,
                            atol=1e-1, rtol=1e-1), (
            f"stride={stride} bf16 max abs err "
            f"{jnp.max(jnp.abs(y_bf16.astype(jnp.float32) - y_ref))}")

    print("KERNEL_OK")
</pallas_src>

<mosaic_0001>
module attributes {stable_mosaic.version = 11 : i64} {
  func.func @block_kernel(%arg0: i32, %arg1: memref<1x8x384xf32, #tpu.memory_space<vmem>>, %arg2: memref<3x8x8xf32, #tpu.memory_space<vmem>>, %arg3: memref<3x8x8xf32, #tpu.memory_space<vmem>>, %arg4: memref<3x8x8xf32, #tpu.memory_space<vmem>>, %arg5: memref<8x8xf32, #tpu.memory_space<vmem>>, %arg6: memref<8x384xf32, #tpu.memory_space<vmem>>) attributes {dimension_semantics = [#tpu.dimension_semantics<parallel>], iteration_bounds = array<i64: 2>, scalar_prefetch = 0 : i64, scratch_operands = 0 : i64, tpu.core_type = #tpu.core_type<tc>, window_params = [{transform_indices = @transform_0, window_bounds = array<i64: 1, 8, 384>}, {pipeline_mode = #tpu.pipeline_mode<synchronous>, transform_indices = @transform_1, window_bounds = array<i64: 3, 8, 8>}, {pipeline_mode = #tpu.pipeline_mode<synchronous>, transform_indices = @transform_2, window_bounds = array<i64: 3, 8, 8>}, {pipeline_mode = #tpu.pipeline_mode<synchronous>, transform_indices = @transform_3, window_bounds = array<i64: 3, 8, 8>}, {pipeline_mode = #tpu.pipeline_mode<synchronous>, transform_indices = @transform_4, window_bounds = array<i64: 8, 8>}, {transform_indices = @transform_5, window_bounds = array<i64: 8, 384>}]} {
    %c0 = arith.constant 0 : index
    %c0_0 = arith.constant 0 : index
    %c0_1 = arith.constant 0 : index
    %0 = vector.load %arg1[%c0, %c0_0, %c0_1] : memref<1x8x384xf32, #tpu.memory_space<vmem>>, vector<1x8x384xf32>
    %c0_2 = arith.constant 0 : index
    %c0_3 = arith.constant 0 : index
    %c0_4 = arith.constant 0 : index
    %1 = vector.load %arg2[%c0_2, %c0_3, %c0_4] : memref<3x8x8xf32, #tpu.memory_space<vmem>>, vector<3x8x8xf32>
    %c0_5 = arith.constant 0 : index
    %c0_6 = arith.constant 0 : index
    %c0_7 = arith.constant 0 : index
    %2 = vector.load %arg3[%c0_5, %c0_6, %c0_7] : memref<3x8x8xf32, #tpu.memory_space<vmem>>, vector<3x8x8xf32>
    %c0_8 = arith.constant 0 : index
    %c0_9 = arith.constant 0 : index
    %c0_10 = arith.constant 0 : index
    %3 = vector.load %arg4[%c0_8, %c0_9, %c0_10] : memref<3x8x8xf32, #tpu.memory_space<vmem>>, vector<3x8x8xf32>
    %c0_11 = arith.constant 0 : index
    %c0_12 = arith.constant 0 : index
    %4 = vector.load %arg5[%c0_11, %c0_12] : memref<8x8xf32, #tpu.memory_space<vmem>>, vector<8x8xf32>
    %5 = vector.extract_strided_slice %4 {offsets = [0, 0], sizes = [8, 1], strides = [1, 1]} : vector<8x8xf32> to vector<8x1xf32>
    %6 = vector.extract_strided_slice %4 {offsets = [0, 1], sizes = [8, 1], strides = [1, 1]} : vector<8x8xf32> to vector<8x1xf32>
    %7 = vector.extract_strided_slice %4 {offsets = [0, 2], sizes = [8, 1], strides = [1, 1]} : vector<8x8xf32> to vector<8x1xf32>
    %8 = vector.extract_strided_slice %4 {offsets = [0, 3], sizes = [8, 1], strides = [1, 1]} : vector<8x8xf32> to vector<8x1xf32>
    %9 = vector.extract_strided_slice %4 {offsets = [0, 4], sizes = [8, 1], strides = [1, 1]} : vector<8x8xf32> to vector<8x1xf32>
    %10 = vector.extract_strided_slice %4 {offsets = [0, 5], sizes = [8, 1], strides = [1, 1]} : vector<8x8xf32> to vector<8x1xf32>
    %11 = vector.extract_strided_slice %4 {offsets = [0, 6], sizes = [8, 1], strides = [1, 1]} : vector<8x8xf32> to vector<8x1xf32>
    %12 = tpu.iota {dimensions = array<i32: 1>} : vector<1x384xi32>
    %c0_i32 = arith.constant 0 : i32
    %13 = vector.broadcast %c0_i32 : i32 to vector<1x384xi32>
    %14 = arith.cmpi sge, %12, %13 : vector<1x384xi32>
    %c16_i32 = arith.constant 16 : i32
    %15 = vector.broadcast %c16_i32 : i32 to vector<1x384xi32>
    %16 = arith.cmpi slt, %12, %15 : vector<1x384xi32>
    %17 = arith.andi %14, %16 : vector<1x384xi1>
    %c128_i32 = arith.constant 128 : i32
    %18 = vector.broadcast %c128_i32 : i32 to vector<1x384xi32>
    %19 = arith.cmpi sge, %12, %18 : vector<1x384xi32>
    %c144_i32 = arith.constant 144 : i32
    %20 = vector.broadcast %c144_i32 : i32 to vector<1x384xi32>
    %21 = arith.cmpi slt, %12, %20 : vector<1x384xi32>
    %22 = arith.andi %19, %21 : vector<1x384xi1>
    %23 = arith.ori %17, %22 : vector<1x384xi1>
    %c256_i32 = arith.constant 256 : i32
    %24 = vector.broadcast %c256_i32 : i32 to vector<1x384xi32>
    %25 = arith.cmpi sge, %12, %24 : vector<1x384xi32>
    %c272_i32 = arith.constant 272 : i32
    %26 = vector.broadcast %c272_i32 : i32 to vector<1x384xi32>
    %27 = arith.cmpi slt, %12, %26 : vector<1x384xi32>
    %28 = arith.andi %25, %27 : vector<1x384xi1>
    %29 = arith.ori %23, %28 : vector<1x384xi1>
    %30 = vector.shape_cast %0 : vector<1x8x384xf32> to vector<8x384xf32>
    %31 = vector.extract_strided_slice %1 {offsets = [0, 0, 0], sizes = [1, 8, 8], strides = [1, 1, 1]} : vector<3x8x8xf32> to vector<1x8x8xf32>
    %32 = vector.shape_cast %31 : vector<1x8x8xf32> to vector<8x8xf32>
    %cst = arith.constant dense<0.000000e+00> : vector<8x384xf32>
    %33 = tpu.matmul %32, %30, %cst {dimension_numbers = #tpu.dot_dimension_numbers<[1], [0], [0], [1], [0, 0, 1, 1], [], []>} : vector<8x8xf32>, vector<8x384xf32>, vector<8x384xf32> -> vector<8x384xf32>
    %34 = vector.extract_strided_slice %3 {offsets = [0, 0, 0], sizes = [1, 8, 8], strides = [1, 1, 1]} : vector<3x8x8xf32> to vector<1x8x8xf32>
    %35 = vector.shape_cast %34 : vector<1x8x8xf32> to vector<8x8xf32>
    %cst_13 = arith.constant dense<0.000000e+00> : vector<8x384xf32>
    %36 = tpu.matmul %35, %30, %cst_13 {dimension_numbers = #tpu.dot_dimension_numbers<[1], [0], [0], [1], [0, 0, 1, 1], [], []>} : vector<8x8xf32>, vector<8x384xf32>, vector<8x384xf32> -> vector<8x384xf32>
    %37 = vector.shape_cast %0 : vector<1x8x384xf32> to vector<8x384xf32>
    %c383_i32 = arith.constant 383 : i32
    %38 = tpu.dynamic_rotate %37 by %c383_i32 dim 1 : vector<8x384xf32>, i32 -> vector<8x384xf32>
    %39 = vector.extract_strided_slice %1 {offsets = [1, 0, 0], sizes = [1, 8, 8], strides = [1, 1, 1]} : vector<3x8x8xf32> to vector<1x8x8xf32>
    %40 = vector.shape_cast %39 : vector<1x8x8xf32> to vector<8x8xf32>
    %cst_14 = arith.constant dense<0.000000e+00> : vector<8x384xf32>
    %41 = tpu.matmul %40, %38, %cst_14 {dimension_numbers = #tpu.dot_dimension_numbers<[1], [0], [0], [1], [0, 0, 1, 1], [], []>} : vector<8x8xf32>, vector<8x384xf32>, vector<8x384xf32> -> vector<8x384xf32>
    %42 = vector.extract_strided_slice %3 {offsets = [1, 0, 0], sizes = [1, 8, 8], strides = [1, 1, 1]} : vector<3x8x8xf32> to vector<1x8x8xf32>
    %43 = vector.shape_cast %42 : vector<1x8x8xf32> to vector<8x8xf32>
    %cst_15 = arith.constant dense<0.000000e+00> : vector<8x384xf32>
    %44 = tpu.matmul %43, %38, %cst_15 {dimension_numbers = #tpu.dot_dimension_numbers<[1], [0], [0], [1], [0, 0, 1, 1], [], []>} : vector<8x8xf32>, vector<8x384xf32>, vector<8x384xf32> -> vector<8x384xf32>
    %45 = arith.addf %33, %41 : vector<8x384xf32>
    %46 = arith.addf %36, %44 : vector<8x384xf32>
    %47 = vector.shape_cast %0 : vector<1x8x384xf32> to vector<8x384xf32>
    %c382_i32 = arith.constant 382 : i32
    %48 = tpu.dynamic_rotate %47 by %c382_i32 dim 1 : vector<8x384xf32>, i32 -> vector<8x384xf32>
    %49 = vector.extract_strided_slice %1 {offsets = [2, 0, 0], sizes = [1, 8, 8], strides = [1, 1, 1]} : vector<3x8x8xf32> to vector<1x8x8xf32>
    %50 = vector.shape_cast %49 : vector<1x8x8xf32> to vector<8x8xf32>
    %cst_16 = arith.constant dense<0.000000e+00> : vector<8x384xf32>
    %51 = tpu.matmul %50, %48, %cst_16 {dimension_numbers = #tpu.dot_dimension_numbers<[1], [0], [0], [1], [0, 0, 1, 1], [], []>} : vector<8x8xf32>, vector<8x384xf32>, vector<8x384xf32> -> vector<8x384xf32>
    %52 = vector.extract_strided_slice %3 {offsets = [2, 0, 0], sizes = [1, 8, 8], strides = [1, 1, 1]} : vector<3x8x8xf32> to vector<1x8x8xf32>
    %53 = vector.shape_cast %52 : vector<1x8x8xf32> to vector<8x8xf32>
    %cst_17 = arith.constant dense<0.000000e+00> : vector<8x384xf32>
    %54 = tpu.matmul %53, %48, %cst_17 {dimension_numbers = #tpu.dot_dimension_numbers<[1], [0], [0], [1], [0, 0, 1, 1], [], []>} : vector<8x8xf32>, vector<8x384xf32>, vector<8x384xf32> -> vector<8x384xf32>
    %55 = arith.addf %45, %51 : vector<8x384xf32>
    %56 = arith.addf %46, %54 : vector<8x384xf32>
    %57 = vector.broadcast %5 : vector<8x1xf32> to vector<8x384xf32>
    %58 = arith.addf %55, %57 : vector<8x384xf32>
    %59 = vector.broadcast %9 : vector<8x1xf32> to vector<8x384xf32>
    %60 = arith.addf %56, %59 : vector<8x384xf32>
    %61 = tpu.iota {dimensions = array<i32: 1>} : vector<1x128xi32>
    %c16_i32_18 = arith.constant 16 : i32
    %62 = vector.broadcast %c16_i32_18 : i32 to vector<1x128xi32>
    %63 = arith.cmpi slt, %61, %62 : vector<1x128xi32>
    %cst_19 = arith.constant 0.000000e+00 : f32
    %64 = vector.broadcast %cst_19 : f32 to vector<1x384xf32>
    %cst_20 = arith.constant 0.000000e+00 : f32
    %65 = vector.broadcast %cst_20 : f32 to vector<1x384xf32>
    %66 = vector.extract_strided_slice %58 {offsets = [0, 0], sizes = [8, 128], strides = [1, 1]} : vector<8x384xf32> to vector<8x128xf32>
    %cst_21 = arith.constant 0.000000e+00 : f32
    %67 = vector.shape_cast %63 : vector<1x128xi1> to vector<1x128xi1>
    %68 = vector.broadcast %67 : vector<1x128xi1> to vector<8x128xi1>
    %69 = vector.broadcast %cst_21 : f32 to vector<8x128xf32>
    %70 = arith.select %68, %66, %69 : vector<8x128xi1>, vector<8x128xf32>
    %71 = vector.shape_cast %70 : vector<8x128xf32> to vector<1x8x128xf32>
    %cst_22 = arith.constant dense<0.000000e+00> : vector<1xf32>
    %72 = vector.multi_reduction <add>, %71, %cst_22 [1, 2] : vector<1x8x128xf32> to vector<1xf32>
    %73 = vector.shape_cast %72 : vector<1xf32> to vector<1x1x1xf32>
    %74 = vector.extract %73[0, 0, 0] : f32 from vector<1x1x1xf32>
    %75 = arith.mulf %70, %70 : vector<8x128xf32>
    %76 = vector.shape_cast %75 : vector<8x128xf32> to vector<1x8x128xf32>
    %cst_23 = arith.constant dense<0.000000e+00> : vector<1xf32>
    %77 = vector.multi_reduction <add>, %76, %cst_23 [1, 2] : vector<1x8x128xf32> to vector<1xf32>
    %78 = vector.shape_cast %77 : vector<1xf32> to vector<1x1x1xf32>
    %79 = vector.extract %78[0, 0, 0] : f32 from vector<1x1x1xf32>
    %cst_24 = arith.constant 7.812500e-03 : f32
    %80 = arith.mulf %74, %cst_24 : f32
    %cst_25 = arith.constant 7.812500e-03 : f32
    %81 = arith.mulf %79, %cst_25 : f32
    %82 = arith.mulf %80, %80 : f32
    %83 = arith.subf %81, %82 : f32
    %cst_26 = arith.constant 0.000000e+00 : f32
    %84 = arith.maximumf %83, %cst_26 : f32
    %cst_27 = arith.constant 9.99999974E-6 : f32
    %85 = arith.addf %84, %cst_27 : f32
    %86 = math.rsqrt %85 : f32
    %c0_i32_28 = arith.constant 0 : i32
    %87 = vector.broadcast %c0_i32_28 : i32 to vector<1x384xi32>
    %88 = arith.cmpi sge, %12, %87 : vector<1x384xi32>
    %c128_i32_29 = arith.constant 128 : i32
    %89 = vector.broadcast %c128_i32_29 : i32 to vector<1x384xi32>
    %90 = arith.cmpi slt, %12, %89 : vector<1x384xi32>
    %91 = arith.andi %88, %90 : vector<1x384xi1>
    %cst_30 = arith.constant 0.000000e+00 : f32
    %92 = vector.broadcast %80 : f32 to vector<1x384xf32>
    %93 = vector.broadcast %cst_30 : f32 to vector<1x384xf32>
    %94 = arith.select %91, %92, %93 : vector<1x384xi1>, vector<1x384xf32>
    %95 = arith.addf %64, %94 : vector<1x384xf32>
    %cst_31 = arith.constant 0.000000e+00 : f32
    %96 = vector.broadcast %86 : f32 to vector<1x384xf32>
    %97 = vector.broadcast %cst_31 : f32 to vector<1x384xf32>
    %98 = arith.select %91, %96, %97 : vector<1x384xi1>, vector<1x384xf32>
    %99 = arith.addf %65, %98 : vector<1x384xf32>
    %100 = vector.extract_strided_slice %58 {offsets = [0, 128], sizes = [8, 128], strides = [1, 1]} : vector<8x384xf32> to vector<8x128xf32>
    %cst_32 = arith.constant 0.000000e+00 : f32
    %101 = vector.shape_cast %63 : vector<1x128xi1> to vector<1x128xi1>
    %102 = vector.broadcast %101 : vector<1x128xi1> to vector<8x128xi1>
    %103 = vector.broadcast %cst_32 : f32 to vector<8x128xf32>
    %104 = arith.select %102, %100, %103 : vector<8x128xi1>, vector<8x128xf32>
    %105 = vector.shape_cast %104 : vector<8x128xf32> to vector<1x8x128xf32>
    %cst_33 = arith.constant dense<0.000000e+00> : vector<1xf32>
    %106 = vector.multi_reduction <add>, %105, %cst_33 [1, 2] : vector<1x8x128xf32> to vector<1xf32>
    %107 = vector.shape_cast %106 : vector<1xf32> to vector<1x1x1xf32>
    %108 = vector.extract %107[0, 0, 0] : f32 from vector<1x1x1xf32>
    %109 = arith.mulf %104, %104 : vector<8x128xf32>
    %110 = vector.shape_cast %109 : vector<8x128xf32> to vector<1x8x128xf32>
    %cst_34 = arith.constant dense<0.000000e+00> : vector<1xf32>
    %111 = vector.multi_reduction <add>, %110, %cst_34 [1, 2] : vector<1x8x128xf32> to vector<1xf32>
    %112 = vector.shape_cast %111 : vector<1xf32> to vector<1x1x1xf32>
    %113 = vector.extract %112[0, 0, 0] : f32 from vector<1x1x1xf32>
    %cst_35 = arith.constant 7.812500e-03 : f32
    %114 = arith.mulf %108, %cst_35 : f32
    %cst_36 = arith.constant 7.812500e-03 : f32
    %115 = arith.mulf %113, %cst_36 : f32
    %116 = arith.mulf %114, %114 : f32
    %117 = arith.subf %115, %116 : f32
    %cst_37 = arith.constant 0.000000e+00 : f32
    %118 = arith.maximumf %117, %cst_37 : f32
    %cst_38 = arith.constant 9.99999974E-6 : f32
    %119 = arith.addf %118, %cst_38 : f32
    %120 = math.rsqrt %119 : f32
    %c128_i32_39 = arith.constant 128 : i32
    %121 = vector.broadcast %c128_i32_39 : i32 to vector<1x384xi32>
    %122 = arith.cmpi sge, %12, %121 : vector<1x384xi32>
    %c256_i32_40 = arith.constant 256 : i32
    %123 = vector.broadcast %c256_i32_40 : i32 to vector<1x384xi32>
    %124 = arith.cmpi slt, %12, %123 : vector<1x384xi32>
    %125 = arith.andi %122, %124 : vector<1x384xi1>
    %cst_41 = arith.constant 0.000000e+00 : f32
    %126 = vector.broadcast %114 : f32 to vector<1x384xf32>
    %127 = vector.broadcast %cst_41 : f32 to vector<1x384xf32>
    %128 = arith.select %125, %126, %127 : vector<1x384xi1>, vector<1x384xf32>
    %129 = arith.addf %95, %128 : vector<1x384xf32>
    %cst_42 = arith.constant 0.000000e+00 : f32
    %130 = vector.broadcast %120 : f32 to vector<1x384xf32>
    %131 = vector.broadcast %cst_42 : f32 to vector<1x384xf32>
    %132 = arith.select %125, %130, %131 : vector<1x384xi1>, vector<1x384xf32>
    %133 = arith.addf %99, %132 : vector<1x384xf32>
    %134 = vector.extract_strided_slice %58 {offsets = [0, 256], sizes = [8, 128], strides = [1, 1]} : vector<8x384xf32> to vector<8x128xf32>
    %cst_43 = arith.constant 0.000000e+00 : f32
    %135 = vector.shape_cast %63 : vector<1x128xi1> to vector<1x128xi1>
    %136 = vector.broadcast %135 : vector<1x128xi1> to vector<8x128xi1>
    %137 = vector.broadcast %cst_43 : f32 to vector<8x128xf32>
    %138 = arith.select %136, %134, %137 : vector<8x128xi1>, vector<8x128xf32>
    %139 = vector.shape_cast %138 : vector<8x128xf32> to vector<1x8x128xf32>
    %cst_44 = arith.constant dense<0.000000e+00> : vector<1xf32>
    %140 = vector.multi_reduction <add>, %139, %cst_44 [1, 2] : vector<1x8x128xf32> to vector<1xf32>
    %141 = vector.shape_cast %140 : vector<1xf32> to vector<1x1x1xf32>
    %142 = vector.extract %141[0, 0, 0] : f32 from vector<1x1x1xf32>
    %143 = arith.mulf %138, %138 : vector<8x128xf32>
    %144 = vector.shape_cast %143 : vector<8x128xf32> to vector<1x8x128xf32>
    %cst_45 = arith.constant dense<0.000000e+00> : vector<1xf32>
    %145 = vector.multi_reduction <add>, %144, %cst_45 [1, 2] : vector<1x8x128xf32> to vector<1xf32>
    %146 = vector.shape_cast %145 : vector<1xf32> to vector<1x1x1xf32>
    %147 = vector.extract %146[0, 0, 0] : f32 from vector<1x1x1xf32>
    %cst_46 = arith.constant 7.812500e-03 : f32
    %148 = arith.mulf %142, %cst_46 : f32
    %cst_47 = arith.constant 7.812500e-03 : f32
    %149 = arith.mulf %147, %cst_47 : f32
    %150 = arith.mulf %148, %148 : f32
    %151 = arith.subf %149, %150 : f32
    %cst_48 = arith.constant 0.000000e+00 : f32
    %152 = arith.maximumf %151, %cst_48 : f32
    %cst_49 = arith.constant 9.99999974E-6 : f32
    %153 = arith.addf %152, %cst_49 : f32
    %154 = math.rsqrt %153 : f32
    %c256_i32_50 = arith.constant 256 : i32
    %155 = vector.broadcast %c256_i32_50 : i32 to vector<1x384xi32>
    %156 = arith.cmpi sge, %12, %155 : vector<1x384xi32>
    %c384_i32 = arith.constant 384 : i32
    %157 = vector.broadcast %c384_i32 : i32 to vector<1x384xi32>
    %158 = arith.cmpi slt, %12, %157 : vector<1x384xi32>
    %159 = arith.andi %156, %158 : vector<1x384xi1>
    %cst_51 = arith.constant 0.000000e+00 : f32
    %160 = vector.broadcast %148 : f32 to vector<1x384xf32>
    %161 = vector.broadcast %cst_51 : f32 to vector<1x384xf32>
    %162 = arith.select %159, %160, %161 : vector<1x384xi1>, vector<1x384xf32>
    %163 = arith.addf %129, %162 : vector<1x384xf32>
    %cst_52 = arith.constant 0.000000e+00 : f32
    %164 = vector.broadcast %154 : f32 to vector<1x384xf32>
    %165 = vector.broadcast %cst_52 : f32 to vector<1x384xf32>
    %166 = arith.select %159, %164, %165 : vector<1x384xi1>, vector<1x384xf32>
    %167 = arith.addf %133, %166 : vector<1x384xf32>
    %168 = vector.broadcast %163 : vector<1x384xf32> to vector<8x384xf32>
    %169 = arith.subf %58, %168 : vector<8x384xf32>
    %170 = vector.broadcast %167 : vector<1x384xf32> to vector<8x384xf32>
    %171 = arith.mulf %169, %170 : vector<8x384xf32>
    %172 = vector.broadcast %6 : vector<8x1xf32> to vector<8x384xf32>
    %173 = arith.mulf %171, %172 : vector<8x384xf32>
    %174 = vector.broadcast %7 : vector<8x1xf32> to vector<8x384xf32>
    %175 = arith.addf %173, %174 : vector<8x384xf32>
    %cst_53 = arith.constant 0.000000e+00 : f32
    %176 = vector.broadcast %cst_53 : f32 to vector<8x384xf32>
    %177 = arith.cmpf ogt, %175, %176 : vector<8x384xf32>
    %cst_54 = arith.constant 0.00999999977 : f32
    %178 = vector.broadcast %cst_54 : f32 to vector<8x384xf32>
    %179 = arith.mulf %178, %175 : vector<8x384xf32>
    %180 = arith.select %177, %175, %179 : vector<8x384xi1>, vector<8x384xf32>
    %cst_55 = arith.constant 0.000000e+00 : f32
    %181 = vector.shape_cast %29 : vector<1x384xi1> to vector<1x384xi1>
    %182 = vector.broadcast %181 : vector<1x384xi1> to vector<8x384xi1>
    %183 = vector.broadcast %cst_55 : f32 to vector<8x384xf32>
    %184 = arith.select %182, %180, %183 : vector<8x384xi1>, vector<8x384xf32>
    %185 = vector.extract_strided_slice %2 {offsets = [1, 0, 0], sizes = [1, 8, 8], strides = [1, 1, 1]} : vector<3x8x8xf32> to vector<1x8x8xf32>
    %186 = vector.shape_cast %185 : vector<1x8x8xf32> to vector<8x8xf32>
    %cst_56 = arith.constant dense<0.000000e+00> : vector<8x384xf32>
    %187 = tpu.matmul %186, %184, %cst_56 {dimension_numbers = #tpu.dot_dimension_numbers<[1], [0], [0], [1], [0, 0, 1, 1], [], []>} : vector<8x8xf32>, vector<8x384xf32>, vector<8x384xf32> -> vector<8x384xf32>
    %188 = vector.extract_strided_slice %2 {offsets = [0, 0, 0], sizes = [1, 8, 8], strides = [1, 1, 1]} : vector<3x8x8xf32> to vector<1x8x8xf32>
    %189 = vector.shape_cast %188 : vector<1x8x8xf32> to vector<8x8xf32>
    %c1_i32 = arith.constant 1 : i32
    %190 = tpu.dynamic_rotate %184 by %c1_i32 dim 1 : vector<8x384xf32>, i32 -> vector<8x384xf32>
    %cst_57 = arith.constant dense<0.000000e+00> : vector<8x384xf32>
    %191 = tpu.matmul %189, %190, %cst_57 {dimension_numbers = #tpu.dot_dimension_numbers<[1], [0], [0], [1], [0, 0, 1, 1], [], []>} : vector<8x8xf32>, vector<8x384xf32>, vector<8x384xf32> -> vector<8x384xf32>
    %192 = arith.addf %187, %191 : vector<8x384xf32>
    %193 = vector.extract_strided_slice %2 {offsets = [2, 0, 0], sizes = [1, 8, 8], strides = [1, 1, 1]} : vector<3x8x8xf32> to vector<1x8x8xf32>
    %194 = vector.shape_cast %193 : vector<1x8x8xf32> to vector<8x8xf32>
    %c383_i32_58 = arith.constant 383 : i32
    %195 = tpu.dynamic_rotate %184 by %c383_i32_58 dim 1 : vector<8x384xf32>, i32 -> vector<8x384xf32>
    %cst_59 = arith.constant dense<0.000000e+00> : vector<8x384xf32>
    %196 = tpu.matmul %194, %195, %cst_59 {dimension_numbers = #tpu.dot_dimension_numbers<[1], [0], [0], [1], [0, 0, 1, 1], [], []>} : vector<8x8xf32>, vector<8x384xf32>, vector<8x384xf32> -> vector<8x384xf32>
    %197 = arith.addf %192, %196 : vector<8x384xf32>
    %198 = vector.broadcast %8 : vector<8x1xf32> to vector<8x384xf32>
    %199 = arith.addf %197, %198 : vector<8x384xf32>
    %200 = arith.addf %199, %60 : vector<8x384xf32>
    %201 = tpu.iota {dimensions = array<i32: 1>} : vector<1x128xi32>
    %c16_i32_60 = arith.constant 16 : i32
    %202 = vector.broadcast %c16_i32_60 : i32 to vector<1x128xi32>
    %203 = arith.cmpi slt, %201, %202 : vector<1x128xi32>
    %cst_61 = arith.constant 0.000000e+00 : f32
    %204 = vector.broadcast %cst_61 : f32 to vector<1x384xf32>
    %cst_62 = arith.constant 0.000000e+00 : f32
    %205 = vector.broadcast %cst_62 : f32 to vector<1x384xf32>
    %206 = vector.extract_strided_slice %200 {offsets = [0, 0], sizes = [8, 128], strides = [1, 1]} : vector<8x384xf32> to vector<8x128xf32>
    %cst_63 = arith.constant 0.000000e+00 : f32
    %207 = vector.shape_cast %203 : vector<1x128xi1> to vector<1x128xi1>
    %208 = vector.broadcast %207 : vector<1x128xi1> to vector<8x128xi1>
    %209 = vector.broadcast %cst_63 : f32 to vector<8x128xf32>
    %210 = arith.select %208, %206, %209 : vector<8x128xi1>, vector<8x128xf32>
    %211 = vector.shape_cast %210 : vector<8x128xf32> to vector<1x8x128xf32>
    %cst_64 = arith.constant dense<0.000000e+00> : vector<1xf32>
    %212 = vector.multi_reduction <add>, %211, %cst_64 [1, 2] : vector<1x8x128xf32> to vector<1xf32>
    %213 = vector.shape_cast %212 : vector<1xf32> to vector<1x1x1xf32>
    %214 = vector.extract %213[0, 0, 0] : f32 from vector<1x1x1xf32>
    %215 = arith.mulf %210, %210 : vector<8x128xf32>
    %216 = vector.shape_cast %215 : vector<8x128xf32> to vector<1x8x128xf32>
    %cst_65 = arith.constant dense<0.000000e+00> : vector<1xf32>
    %217 = vector.multi_reduction <add>, %216, %cst_65 [1, 2] : vector<1x8x128xf32> to vector<1xf32>
    %218 = vector.shape_cast %217 : vector<1xf32> to vector<1x1x1xf32>
    %219 = vector.extract %218[0, 0, 0] : f32 from vector<1x1x1xf32>
    %cst_66 = arith.constant 7.812500e-03 : f32
    %220 = arith.mulf %214, %cst_66 : f32
    %cst_67 = arith.constant 7.812500e-03 : f32
    %221 = arith.mulf %219, %cst_67 : f32
    %222 = arith.mulf %220, %220 : f32
    %223 = arith.subf %221, %222 : f32
    %cst_68 = arith.constant 0.000000e+00 : f32
    %224 = arith.maximumf %223, %cst_68 : f32
    %cst_69 = arith.constant 9.99999974E-6 : f32
    %225 = arith.addf %224, %cst_69 : f32
    %226 = math.rsqrt %225 : f32
    %c0_i32_70 = arith.constant 0 : i32
    %227 = vector.broadcast %c0_i32_70 : i32 to vector<1x384xi32>
    %228 = arith.cmpi sge, %12, %227 : vector<1x384xi32>
    %c128_i32_71 = arith.constant 128 : i32
    %229 = vector.broadcast %c128_i32_71 : i32 to vector<1x384xi32>
    %230 = arith.cmpi slt, %12, %229 : vector<1x384xi32>
    %231 = arith.andi %228, %230 : vector<1x384xi1>
    %cst_72 = arith.constant 0.000000e+00 : f32
    %232 = vector.broadcast %220 : f32 to vector<1x384xf32>
    %233 = vector.broadcast %cst_72 : f32 to vector<1x384xf32>
    %234 = arith.select %231, %232, %233 : vector<1x384xi1>, vector<1x384xf32>
    %235 = arith.addf %204, %234 : vector<1x384xf32>
    %cst_73 = arith.constant 0.000000e+00 : f32
    %236 = vector.broadcast %226 : f32 to vector<1x384xf32>
    %237 = vector.broadcast %cst_73 : f32 to vector<1x384xf32>
    %238 = arith.select %231, %236, %237 : vector<1x384xi1>, vector<1x384xf32>
    %239 = arith.addf %205, %238 : vector<1x384xf32>
    %240 = vector.extract_strided_slice %200 {offsets = [0, 128], sizes = [8, 128], strides = [1, 1]} : vector<8x384xf32> to vector<8x128xf32>
    %cst_74 = arith.constant 0.000000e+00 : f32
    %241 = vector.shape_cast %203 : vector<1x128xi1> to vector<1x128xi1>
    %242 = vector.broadcast %241 : vector<1x128xi1> to vector<8x128xi1>
    %243 = vector.broadcast %cst_74 : f32 to vector<8x128xf32>
    %244 = arith.select %242, %240, %243 : vector<8x128xi1>, vector<8x128xf32>
    %245 = vector.shape_cast %244 : vector<8x128xf32> to vector<1x8x128xf32>
    %cst_75 = arith.constant dense<0.000000e+00> : vector<1xf32>
    %246 = vector.multi_reduction <add>, %245, %cst_75 [1, 2] : vector<1x8x128xf32> to vector<1xf32>
    %247 = vector.shape_cast %246 : vector<1xf32> to vector<1x1x1xf32>
    %248 = vector.extract %247[0, 0, 0] : f32 from vector<1x1x1xf32>
    %249 = arith.mulf %244, %244 : vector<8x128xf32>
    %250 = vector.shape_cast %249 : vector<8x128xf32> to vector<1x8x128xf32>
    %cst_76 = arith.constant dense<0.000000e+00> : vector<1xf32>
    %251 = vector.multi_reduction <add>, %250, %cst_76 [1, 2] : vector<1x8x128xf32> to vector<1xf32>
    %252 = vector.shape_cast %251 : vector<1xf32> to vector<1x1x1xf32>
    %253 = vector.extract %252[0, 0, 0] : f32 from vector<1x1x1xf32>
    %cst_77 = arith.constant 7.812500e-03 : f32
    %254 = arith.mulf %248, %cst_77 : f32
    %cst_78 = arith.constant 7.812500e-03 : f32
    %255 = arith.mulf %253, %cst_78 : f32
    %256 = arith.mulf %254, %254 : f32
    %257 = arith.subf %255, %256 : f32
    %cst_79 = arith.constant 0.000000e+00 : f32
    %258 = arith.maximumf %257, %cst_79 : f32
    %cst_80 = arith.constant 9.99999974E-6 : f32
    %259 = arith.addf %258, %cst_80 : f32
    %260 = math.rsqrt %259 : f32
    %c128_i32_81 = arith.constant 128 : i32
    %261 = vector.broadcast %c128_i32_81 : i32 to vector<1x384xi32>
    %262 = arith.cmpi sge, %12, %261 : vector<1x384xi32>
    %c256_i32_82 = arith.constant 256 : i32
    %263 = vector.broadcast %c256_i32_82 : i32 to vector<1x384xi32>
    %264 = arith.cmpi slt, %12, %263 : vector<1x384xi32>
    %265 = arith.andi %262, %264 : vector<1x384xi1>
    %cst_83 = arith.constant 0.000000e+00 : f32
    %266 = vector.broadcast %254 : f32 to vector<1x384xf32>
    %267 = vector.broadcast %cst_83 : f32 to vector<1x384xf32>
    %268 = arith.select %265, %266, %267 : vector<1x384xi1>, vector<1x384xf32>
    %269 = arith.addf %235, %268 : vector<1x384xf32>
    %cst_84 = arith.constant 0.000000e+00 : f32
    %270 = vector.broadcast %260 : f32 to vector<1x384xf32>
    %271 = vector.broadcast %cst_84 : f32 to vector<1x384xf32>
    %272 = arith.select %265, %270, %271 : vector<1x384xi1>, vector<1x384xf32>
    %273 = arith.addf %239, %272 : vector<1x384xf32>
    %274 = vector.extract_strided_slice %200 {offsets = [0, 256], sizes = [8, 128], strides = [1, 1]} : vector<8x384xf32> to vector<8x128xf32>
    %cst_85 = arith.constant 0.000000e+00 : f32
    %275 = vector.shape_cast %203 : vector<1x128xi1> to vector<1x128xi1>
    %276 = vector.broadcast %275 : vector<1x128xi1> to vector<8x128xi1>
    %277 = vector.broadcast %cst_85 : f32 to vector<8x128xf32>
    %278 = arith.select %276, %274, %277 : vector<8x128xi1>, vector<8x128xf32>
    %279 = vector.shape_cast %278 : vector<8x128xf32> to vector<1x8x128xf32>
    %cst_86 = arith.constant dense<0.000000e+00> : vector<1xf32>
    %280 = vector.multi_reduction <add>, %279, %cst_86 [1, 2] : vector<1x8x128xf32> to vector<1xf32>
    %281 = vector.shape_cast %280 : vector<1xf32> to vector<1x1x1xf32>
    %282 = vector.extract %281[0, 0, 0] : f32 from vector<1x1x1xf32>
    %283 = arith.mulf %278, %278 : vector<8x128xf32>
    %284 = vector.shape_cast %283 : vector<8x128xf32> to vector<1x8x128xf32>
    %cst_87 = arith.constant dense<0.000000e+00> : vector<1xf32>
    %285 = vector.multi_reduction <add>, %284, %cst_87 [1, 2] : vector<1x8x128xf32> to vector<1xf32>
    %286 = vector.shape_cast %285 : vector<1xf32> to vector<1x1x1xf32>
    %287 = vector.extract %286[0, 0, 0] : f32 from vector<1x1x1xf32>
    %cst_88 = arith.constant 7.812500e-03 : f32
    %288 = arith.mulf %282, %cst_88 : f32
    %cst_89 = arith.constant 7.812500e-03 : f32
    %289 = arith.mulf %287, %cst_89 : f32
    %290 = arith.mulf %288, %288 : f32
    %291 = arith.subf %289, %290 : f32
    %cst_90 = arith.constant 0.000000e+00 : f32
    %292 = arith.maximumf %291, %cst_90 : f32
    %cst_91 = arith.constant 9.99999974E-6 : f32
    %293 = arith.addf %292, %cst_91 : f32
    %294 = math.rsqrt %293 : f32
    %c256_i32_92 = arith.constant 256 : i32
    %295 = vector.broadcast %c256_i32_92 : i32 to vector<1x384xi32>
    %296 = arith.cmpi sge, %12, %295 : vector<1x384xi32>
    %c384_i32_93 = arith.constant 384 : i32
    %297 = vector.broadcast %c384_i32_93 : i32 to vector<1x384xi32>
    %298 = arith.cmpi slt, %12, %297 : vector<1x384xi32>
    %299 = arith.andi %296, %298 : vector<1x384xi1>
    %cst_94 = arith.constant 0.000000e+00 : f32
    %300 = vector.broadcast %288 : f32 to vector<1x384xf32>
    %301 = vector.broadcast %cst_94 : f32 to vector<1x384xf32>
    %302 = arith.select %299, %300, %301 : vector<1x384xi1>, vector<1x384xf32>
    %303 = arith.addf %269, %302 : vector<1x384xf32>
    %cst_95 = arith.constant 0.000000e+00 : f32
    %304 = vector.broadcast %294 : f32 to vector<1x384xf32>
    %305 = vector.broadcast %cst_95 : f32 to vector<1x384xf32>
    %306 = arith.select %299, %304, %305 : vector<1x384xi1>, vector<1x384xf32>
    %307 = arith.addf %273, %306 : vector<1x384xf32>
    %308 = vector.broadcast %303 : vector<1x384xf32> to vector<8x384xf32>
    %309 = arith.subf %200, %308 : vector<8x384xf32>
    %310 = vector.broadcast %307 : vector<1x384xf32> to vector<8x384xf32>
    %311 = arith.mulf %309, %310 : vector<8x384xf32>
    %312 = vector.broadcast %10 : vector<8x1xf32> to vector<8x384xf32>
    %313 = arith.mulf %311, %312 : vector<8x384xf32>
    %314 = vector.broadcast %11 : vector<8x1xf32> to vector<8x384xf32>
    %315 = arith.addf %313, %314 : vector<8x384xf32>
    %cst_96 = arith.constant 0.000000e+00 : f32
    %316 = vector.broadcast %cst_96 : f32 to vector<8x384xf32>
    %317 = arith.cmpf ogt, %315, %316 : vector<8x384xf32>
    %cst_97 = arith.constant 0.00999999977 : f32
    %318 = vector.broadcast %cst_97 : f32 to vector<8x384xf32>
    %319 = arith.mulf %318, %315 : vector<8x384xf32>
    %320 = arith.select %317, %315, %319 : vector<8x384xi1>, vector<8x384xf32>
    %c0_98 = arith.constant 0 : index
    %c0_99 = arith.constant 0 : index
    %321 = vector.load %arg6[%c0_98, %c0_99] : memref<8x384xf32, #tpu.memory_space<vmem>>, vector<8x384xf32>
    tpu.vector_store %arg6[%c0_98, %c0_99], %320 {strides = array<i32>} : memref<8x384xf32, #tpu.memory_space<vmem>>, vector<8x384xf32>,
    return
  }
  func.func @transform_0(%arg0: i32) -> (i32, i32, i32) {
    %c0_i32 = arith.constant 0 : i32
    %c0_i32_0 = arith.constant 0 : i32
    %c0_i32_1 = arith.constant 0 : i32
    return %c0_i32, %c0_i32_0, %arg0 : i32, i32, i32
  }
  func.func @transform_1(%arg0: i32) -> (i32, i32, i32) {
    %c0_i32 = arith.constant 0 : i32
    %c0_i32_0 = arith.constant 0 : i32
    %c0_i32_1 = arith.constant 0 : i32
    %c0_i32_2 = arith.constant 0 : i32
    return %c0_i32, %c0_i32_0, %c0_i32_1 : i32, i32, i32
  }
  func.func @transform_2(%arg0: i32) -> (i32, i32, i32) {
    %c0_i32 = arith.constant 0 : i32
    %c0_i32_0 = arith.constant 0 : i32
    %c0_i32_1 = arith.constant 0 : i32
    %c0_i32_2 = arith.constant 0 : i32
    return %c0_i32, %c0_i32_0, %c0_i32_1 : i32, i32, i32
  }
  func.func @transform_3(%arg0: i32) -> (i32, i32, i32) {
    %c0_i32 = arith.constant 0 : i32
    %c0_i32_0 = arith.constant 0 : i32
    %c0_i32_1 = arith.constant 0 : i32
    %c0_i32_2 = arith.constant 0 : i32
    return %c0_i32, %c0_i32_0, %c0_i32_1 : i32, i32, i32
  }
  func.func @transform_4(%arg0: i32) -> (i32, i32) {
    %c0_i32 = arith.constant 0 : i32
    %c0_i32_0 = arith.constant 0 : i32
    %c0_i32_1 = arith.constant 0 : i32
    return %c0_i32, %c0_i32_0 : i32, i32
  }
  func.func @transform_5(%arg0: i32) -> (i32, i32) {
    %c0_i32 = arith.constant 0 : i32
    %c0_i32_0 = arith.constant 0 : i32
    return %c0_i32, %arg0 : i32, i32
  }
}

</mosaic_0001>

<bundles_post_ra>
// kernel: tpu_custom_call.1
= control target key start
LH: loop header
LB: loop body
LE: loop exit
PB: predicated region body
PF: predicated region fallthrough
CT: control target
= control target key end

     0   :  { %10 = vsyncpa [#allocation3], 0  ;;  %s3135_s0 = inlined_call_operand.hbm [shape: f32[1,8,768], index: 0, kind: input, shape index: {}]   ;;  %s3136_s1 = inlined_call_operand.hbm [shape: f32[3,8,8], index: 1, kind: input, shape index: {}]   ;;  %s3137_s2 = inlined_call_operand.hbm [shape: f32[3,8,8], index: 2, kind: input, shape index: {}]   ;;  %s3138_s3 = inlined_call_operand.hbm [shape: f32[3,8,8], index: 3, kind: input, shape index: {}]   ;;  %s3139_s4 = inlined_call_operand.vmem [shape: f32[8,8], index: 4, kind: input, shape index: {}]   ;;  %s3140_s5 = inlined_call_operand.hbm [shape: f32[8,768], index: 5, kind: output, shape index: {}]  }
   0x1   :  { %12 = vsyncpa [#allocation3 + $0x1], 0 }
   0x2   :  { %13 = vsyncpa [#allocation6], 0 }
   0x3   :  { %14 = vsyncpa [#allocation9], 0 }
   0x4   :  { %15 = vsyncpa [#allocation4], 0 }
   0x5   :  { %17 = vsyncpa [#allocation4 + $0x1], 0  ;;  %s2688_s18 = smov 0   ;;  %s2690_s19 = smov 0  }
   0x6   :  { %s2692_s20 = smov 0   ;;  %s2694_s21 = smov 0  }
   0x7 LB: > { %s2709_s22 = sadd.s32 4294967295, %s2636_s21   ;;  %s2169_s23 = sadd.s32 4294967294, %s2636_s21   ;;  %s2636_s21 = sphi %s2694_s21, %s3163_s21   ;;  %s2632_s20 = sphi %s2692_s20, %s3162_s20   ;;  %s2628_s19 = sphi %s2690_s19, %s3161_s19   ;;  %s2624_s18 = sphi %s2688_s18, %s3160_s18  }
   0x8   : > { %p43_p0 = scmp.ne.s32.totalorder %s2628_s19, %s2624_s18  ;;  %p3141_p1 = scmp.eq.s32.totalorder %s2709_s22, 0 }
   0x9   : > { %p157_p3 = scmp.eq.s32.totalorder %s2169_s23, 1  ;;  %p2170_p5 = scmp.ge.s32.totalorder %s2636_s21, 1 }
   0xa   : > { %p2718_p4 = por %p3141_p1, %p43_p0  ;;  %p164_p7 = scmp.lt.s32.totalorder %s2636_s21, 3 }
   0xb   : > { %p2723_p6 = por %p157_p3, %p43_p0  ;;  %s2638_s27 = smov [#allocation5]  }
   0xc   : > { %s3144_s24 = scalar_select %p2718_p4, 1, 0 }
   0xd   : > { %s3145_s25 = scalar_select %p2723_p6, 1, 0 }
   0xe   : > { %p2728_p8 = pnand %p2170_p5, %p164_p7  ;;  %s176_s28 = sshll.u32 %s2638_s27, 4  ;;  %s2732_s28 = int_to_ptr.vmem [resolvable:$true] %s176_s28 }
   0xf   : > { %s2639_s30 = smov [#allocation7]   ;;  %s2640_s7 = smov [#allocation8]  }
  0x10   : > { %s3146_s26 = scalar_select %p2728_p8, 1, 0 }
  0x11   : > { %p2353_p9 = pneg %p2728_p8  ;;  %s189_s6 = sshll.u32 %s2639_s30, 4  ;;  %s2743_s6 = int_to_ptr.vmem [resolvable:$true] %s189_s6 }
  0x12   : > { %s2745_s8 = sshll.u32 %s2640_s7, 4  ;;  %s2448_s11 = scalar_lea.hbm %s3136_s1, 384  ;;  %s203_s8 = int_to_ptr.vmem [resolvable:$true] %s2745_s8 }
  0x13   : > { %p2739_p11 = pnand %p2353_p9, %p3141_p1  ;;  %p2449_p12 = scmp.ne.s32.totalorder %s3136_s1, %s2448_s11 }
  0x14   : > { %p2455_p5 = scmp.lt.u32.totalorder %s2448_s11, %s3136_s1 }
  0x15   : > { %p2755_p13 = pneg %p2739_p11 }
  0x17   : > { %p2451_p0 = pnand %p2755_p13, %p2449_p12 }
  0x19   : > { %p2452_p3 = pneg %p2451_p0 }
  0x1b   : > { %p2457_p7 = pnand %p2455_p5, %p2452_p3 }
  0x1d   : > { %2460 = shalt.err (!%p2457_p7)
}
  0x1e   : > { %s2461_s17 = scalar_lea.vmem %s2732_s28, 384  ;;  %p2469_p2 = scmp.lt.s32.totalorder %s2732_s28, %s2732_s28 }
  0x1f   : > { %p2462_p9 = scmp.ne.s32.totalorder %s2732_s28, %s2461_s17  ;;  %p2470_p6 = scmp.lt.s32.totalorder %s2461_s17, %s2461_s17 }
  0x21   : > { %p2464_p10 = pnand %p2462_p9, %p2755_p13  ;;  %p2471_p12 = por %p2470_p6, %p2469_p2 }
  0x23   : > { %p2465_p1 = pneg %p2464_p10 }
  0x25   : > { %p2472_p0 = pnand %p2471_p12, %p2465_p1 }
  0x27   : > { %2475 = shalt.err (!%p2472_p0)
}
  0x28   : > { %s2641_s23 = smov 128   ;;  %s2642_s27 = smov 8  }
  0x29   : > { %2356 = dma.hbm_to_vmem [thread:$0]  (!%p2739_p11), %s3136_s1, 384, %s2732_s28, [#allocation6], %s2641_s23, %s2641_s23, %s2642_s27  }
  0x2a   : > { %s2476_s11 = scalar_lea.hbm %s3137_s2, 384 }
  0x2b   : > { %p2477_p1 = scmp.ne.s32.totalorder %s3137_s2, %s2476_s11  ;;  %p2483_p10 = scmp.lt.u32.totalorder %s2476_s11, %s3137_s2 }
  0x2d   : > { %p2479_p2 = pnand %p2477_p1, %p2755_p13 }
  0x2f   : > { %p2480_p6 = pneg %p2479_p2 }
  0x31   : > { %p2485_p3 = pnand %p2483_p10, %p2480_p6 }
  0x33   : > { %2488 = shalt.err (!%p2485_p3)
}
  0x34   : > { %s2489_s28 = scalar_lea.vmem %s2743_s6, 384  ;;  %p2497_p12 = scmp.lt.s32.totalorder %s2743_s6, %s2743_s6 }
  0x35   : > { %p2490_p5 = scmp.ne.s32.totalorder %s2743_s6, %s2489_s28  ;;  %p2498_p0 = scmp.lt.s32.totalorder %s2489_s28, %s2489_s28 }
  0x37   : > { %p2492_p7 = pnand %p2490_p5, %p2755_p13  ;;  %p2499_p1 = por %p2498_p0, %p2497_p12 }
  0x39   : > { %p2493_p9 = pneg %p2492_p7 }
  0x3b   : > { %p2500_p2 = pnand %p2499_p1, %p2493_p9 }
  0x3d   : > { %2503 = shalt.err (!%p2500_p2)
}
  0x3e   : > { %2359 = dma.hbm_to_vmem [thread:$0]  (!%p2739_p11), %s3137_s2, 384, %s2743_s6, [#allocation6], %s2641_s23, %s2641_s23, %s2642_s27  }
  0x3f   : > { %s2504_s10 = scalar_lea.hbm %s3138_s3, 384 }
  0x40   : > { %p2505_p6 = scmp.ne.s32.totalorder %s3138_s3, %s2504_s10  ;;  %p2511_p5 = scmp.lt.u32.totalorder %s2504_s10, %s3138_s3 }
  0x42   : > { %p2507_p10 = pnand %p2505_p6, %p2755_p13 }
  0x44   : > { %p2508_p3 = pneg %p2507_p10 }
  0x46   : > { %p2513_p7 = pnand %p2511_p5, %p2508_p3 }
  0x48   : > { %2516 = shalt.err (!%p2513_p7)
}
  0x49   : > { %s2517_s16 = scalar_lea.vmem %s203_s8, 384  ;;  %p2525_p1 = scmp.lt.s32.totalorder %s203_s8, %s203_s8 }
  0x4a   : > { %p2518_p9 = scmp.ne.s32.totalorder %s203_s8, %s2517_s16  ;;  %p2526_p2 = scmp.lt.s32.totalorder %s2517_s16, %s2517_s16 }
  0x4c   : > { %p2520_p12 = pnand %p2518_p9, %p2755_p13  ;;  %p2527_p4 = por %p2526_p2, %p2525_p1 }
  0x4e   : > { %p2521_p0 = pneg %p2520_p12 }
  0x50   : > { %p2528_p8 = pnand %p2527_p4, %p2521_p0 }
  0x52   : > { %2531 = shalt.err (!%p2528_p8)
}
  0x53   : > { %2362 = dma.hbm_to_vmem [thread:$0]  (!%p2739_p11), %s3138_s3, 384, %s203_s8, [#allocation9], %s2641_s23, %s2641_s23, %s2642_s27  }
  0x54   : > { %s2828_s14 = sadd.s32 1, %s2636_s21   ;;  %s30_s17 = sadd.s32 1, %s2632_s20 }
  0x55   : > { %s27_s29 = ssub.s32 %s2636_s21, %s2828_s14  ;;  %p37_p8 = scmp.ne.s32.totalorder %s2632_s20, %s2628_s19 }
  0x56   : > { %p28_p4 = scmp.eq.s32.totalorder %s27_s29, 0  ;;  %p38_p13 = scmp.eq.s32.totalorder %s2636_s21, 0 }
  0x57   : > { %p2374_p6 = scmp.lt.s32.totalorder %s2636_s21, 2  ;;  %p3149_p3 = scmp.eq.s32.totalorder %s2709_s22, 1 }
  0x58   : > { %s2838_s30 = scalar_select %p28_p4, %s2632_s20, %s30_s17  }
  0x59   : > { %p39_p10 = por %p38_p13, %p37_p8  ;;  %p2842_p5 = por %p3149_p3, %p37_p8 }
  0x5a   : > { %s219_s9 = sand.u32 1, %s2632_s20   ;;  %s2204_s10 = smul.u32 384, %s2636_s21 }
  0x5b   : > { %s2299_s8 = smul.u32 24, %s219_s9  ;;  %p2848_p11 = pnand %p2374_p6, %p39_p10 }
  0x5c   : > { %s2855_s12 = scalar_lea.hbm %s3135_s0, %s2204_s10  ;;  %s220_s16 = scalar_lea.sflag [#allocation3], %s219_s9 }
  0x5d   : > { %s223_s13 = scalar_lea.vmem [#allocation2], %s2299_s8  ;;  %s2532_s6 = scalar_lea.hbm %s2855_s12, 384 }
  0x5e   : > { %s231_s15 = sshll.u32 %s223_s13, 4  ;;  %p2533_p7 = scmp.ne.s32.totalorder %s2855_s12, %s2532_s6  ;;  %s2857_s15 = int_to_ptr.vmem [resolvable:$true] %s231_s15 }
  0x5f   : > { %p2534_p9 = pneg %p2848_p11  ;;  %s2537_s17 = scalar_lea.hbm %s3135_s0, 768 }
  0x60   : > { %p2538_p1 = scmp.lt.u32.totalorder %s2855_s12, %s3135_s0  ;;  %p2539_p2 = scmp.lt.u32.totalorder %s2537_s17, %s2532_s6 }
  0x61   : > { %p2535_p12 = pnand %p2534_p9, %p2533_p7  ;;  %p2541_p8 = scmp.lt.u32.totalorder %s2532_s6, %s2855_s12 }
  0x62   : > { %p2540_p4 = por %p2539_p2, %p2538_p1 }
  0x63   : > { %p2536_p0 = pneg %p2535_p12 }
  0x64   : > { %p2542_p13 = por %p2541_p8, %p2540_p4 }
  0x66   : > { %p2543_p6 = pnand %p2542_p13, %p2536_p0 }
  0x68   : > { %2546 = shalt.err (!%p2543_p6)
}
  0x69   : > { %s2547_s9 = scalar_lea.vmem %s2857_s15, 384  ;;  %s2643_s8 = smov [#allocation2]  }
  0x6a   : > { %p2548_p10 = scmp.ne.s32.totalorder %s2857_s15, %s2547_s9  ;;  %s2552_s11 = sshll.u32 %s2643_s8, 4  ;;  %s2553_s11 = int_to_ptr.vmem [resolvable:$false] %s2552_s11 }
  0x6b   : > { %s2554_s13 = scalar_lea.vmem %s2553_s11, 768  ;;  %p2555_p12 = scmp.lt.s32.totalorder %s2857_s15, %s2553_s11 }
  0x6c   : > { %p2550_p3 = pnand %p2548_p10, %p2534_p9  ;;  %p2556_p1 = scmp.lt.s32.totalorder %s2554_s13, %s2547_s9 }
  0x6e   : > { %p2551_p7 = pneg %p2550_p3  ;;  %p2557_p2 = por %p2556_p1, %p2555_p12 }
  0x70   : > { %p2558_p4 = pnand %p2557_p2, %p2551_p7 }
  0x72   : > { %2561 = shalt.err (!%p2558_p4)
}
  0x73   : > { %2366 = dma.hbm_to_vmem [thread:$0]  (!%p2848_p11), %s2855_s12, 384, %s2857_s15, %s220_s16  }
  0x74   : > { %p3152_p0 = scmp.ne.s32.totalorder %s3146_s26, 0 }
  0x75   : > { %s2887_s6 = sand.u32 (!%p3152_p0), 1, %s2628_s19   ;;  %p3153_p9 = scmp.ne.s32.totalorder (!%p3152_p0), %s3144_s24, 0 }
  0x76   : > { %240 = sbr.rel (%p3152_p0) target bundleno = 1714 (0x6b2), region = 40  ;;  %s243_s29 = scalar_lea.sflag (!%p3152_p0), [#allocation3], %s2887_s6 }
  0x77   : > { %s2300_s28 = smul.u32 (!%p3152_p0), 24, %s2887_s6 }
  0x79   : > { %s246_s17 = scalar_lea.vmem (!%p3152_p0), [#allocation2], %s2300_s28 }
  0x7d   : > { %2607 = dma.done.wait (%p3153_p9), %s243_s29, 384  }
  0x7e   : > { %2609 = vsyncadd (%p3153_p9), %s243_s29, 4294966912  ;;  %p3154_p11 = scmp.eq.s32.totalorder %s2709_s22, 0 }
  0x80   : > { %2611 = dma.done.wait (%p3154_p11), [#allocation6], 768   ;;  %p3155_p8 = pmov %p3154_p11 }
  0x82   : > { %2613 = vsyncadd (%p3155_p8), [#allocation6], 4294966528  ;;  %p3156_p13 = pmov %p3155_p8 }
  0x83   : > { %p3157_p6 = pmov %p3155_p8 }
  0x84   : > { %2615 = dma.done.wait (%p3156_p13), [#allocation9], 384  }
  0x85   : > { %2617 = vsyncadd (%p3157_p6), [#allocation9], 4294966912  ;;  %v2644_v0 = vmov 0.0   ;;  %vm2645_vm0 = vmmov 0   ;;  %v288_v1 = vld [vmem:[%s246_s17 + $0x8] sm:$0xff]  ;;  %v287_v2 = vld [vmem:[%s246_s17] sm:$0xff]  ;;  %v300_v6 = vlaneseq }
  0x86   : > { %2224 = vmatprep.subr.mxu1 %v2644_v0  ;;  %2226 = vmatprep.mubr.msk.f32.mxu1 %vm2645_vm0, %v2644_v0  ;;  %s2646_s24 = smov 127   ;;  %v289_v3 = vld [vmem:[%s246_s17 + $0x10] sm:$0xff]  ;;  %s2647_s26 = smov 126   ;;  %v2915_v4 = vld [vmem:[%s3139_s4] sm:$0xff]  ;;  %v2648_v5 = vmov 0   ;;  %v291_v11 = vld [vmem:[#allocation5 + $0x8] sm:$0xff] }
  0x87   : > { %415 = vmatprep.mubr.f32.mxu0 %v2644_v0  ;;  %339 = vrot.lane.b32.xlu0 %v288_v1, %s2646_s24  ;;  %v2918_v7 = vand.u32 127, %v300_v6  ;;  %vm347_vm2 = vcmask 64512   ;;  %v297_v15 = vld [vmem:[#allocation8 + $0x8] sm:$0xff]  ;;  %v290_v17 = vld [vmem:[#allocation5] sm:$0xff]  ;;  %v296_v20 = vld [vmem:[#allocation8] sm:$0xff]  ;;  %v2649_v45 = vmov 1  }
  0x88   : > { %337 = vrot.lane.b32.xlu1 %v287_v2, %s2646_s24  ;;  %2429 = vset.pattern.permute.xlu0 %v2648_v5  ;;  %v292_v24 = vld [vmem:[#allocation5 + $0x10] sm:$0xff]  ;;  %v2650_v46 = vmov 2   ;;  %s2651_s11 = smov 0.0  }
  0x89   : > { %vm343_vm1 = vcmp.lt.s32.totalorder %v2918_v7, 127  ;;  %vm930_vm3 = vcmp.lt.s32.totalorder %v2918_v7, 126  ;;  %vm307_vm4 = vcmp.lt.s32.totalorder %v2918_v7, 16  ;;  %2430 = vset.pattern.permute.xlu1 %v2649_v45  ;;  %vm1436_vm10 = vcmp.lt.s32.totalorder %v2918_v7, 1 }
  0x8b   : > { %341 = vrot.lane.b32.xlu0 %v289_v3, %s2646_s24 }
  0x8c   : > { %926 = vrot.lane.b32.xlu1 %v288_v1, %s2647_s26 }
  0x8f   : > { %928 = vrot.lane.b32.xlu0 %v289_v3, %s2647_s26 }
  0x90   : > { %924 = vrot.lane.b32.xlu1 %v287_v2, %s2647_s26 }
  0x93   : > { %1230 = vperm.xlu0 %2429, %v2915_v4  }
  0x97   : > { %2431 = vset.pattern.permute.xlu0 %v2650_v46 }
  0xf9   : > { %v340_v8 = vpop.permute.xlu0 %339 }
  0xfa   : > { %v338_v9 = vpop.permute.xlu1 %337 }
  0xfb   : > { %v345_v14 = vsel %vm343_vm1, %v338_v9, %v340_v8 }
  0xfd   : > { %v342_v10 = vpop.permute.xlu0 %341 }
  0xfe   : > { %v344_v12 = vsel %vm343_vm1, %v340_v8, %v342_v10  ;;  %v346_v13 = vsel %vm343_vm1, %v342_v10, %v338_v9  ;;  %v927_v16 = vpop.permute.xlu1 %926 }
  0xff   : > { %351 = vmatprep.subr.mxu0 %v344_v12  ;;  %2225 = vmatpush3.msra.mxu1 %v346_v13 }
 0x100   : > { %352 = vmatpush1.msra.mxu0 %v345_v14  ;;  %2227 = vmatmul.mubr.msk.f32.vlgmr.msra.gmra.mrb[0].mxu1 %vm347_vm2, %v291_v11 }
 0x101   : > { %2229 = vmatprep.subr.mxu1 %v2644_v0  ;;  %2180 = vmatmul.mubr.msk.f32.vlgmr.msra.gmra.mrb[0].mxu0 %vm347_vm2, %v291_v11  ;;  %v929_v18 = vpop.permute.xlu0 %928 }
 0x102   : > { %495 = vmatprep.subr.mxu0 %v344_v12  ;;  %2230 = vmatpush3.msra.mxu1 %v346_v13  ;;  %v925_v19 = vpop.permute.xlu1 %924  ;;  %v931_v21 = vsel %vm930_vm3, %v927_v16, %v929_v18 }
 0x103   : > { %496 = vmatpush1.msra.mxu0 %v345_v14  ;;  %2231 = vmatprep.mubr.msk.f32.mxu1 %vm2645_vm0, %v2644_v0  ;;  %v932_v22 = vsel %vm930_vm3, %v925_v19, %v927_v16  ;;  %v933_v23 = vsel %vm930_vm3, %v929_v18, %v925_v19 }
 0x104   : > { %559 = vmatprep.mubr.f32.mxu0 %v2644_v0  ;;  %2232 = vmatmul.mubr.msk.f32.vlgmr.msra.gmra.mrb[2].mxu1 %vm347_vm2, %v297_v15 }
 0x105   : > { %2182 = vmatmul.mubr.msk.f32.vlgmr.msra.gmra.mrb[2].mxu0 %vm347_vm2, %v297_v15  ;;  %2234 = vmatprep.subr.mxu1 %v2644_v0 }
 0x106   : > { %639 = vmatprep.subr.mxu0 %v288_v1  ;;  %2235 = vmatpush3.msra.mxu1 %v289_v3 }
 0x107   : > { %2236 = vmatprep.mubr.msk.f32.mxu1 %vm2645_vm0, %v2644_v0  ;;  %640 = vmatpush1.msra.mxu0 %v287_v2 }
 0x108   : > { %703 = vmatprep.mubr.f32.mxu0 %v2644_v0  ;;  %2237 = vmatmul.mubr.msk.f32.vlgmr.msra.gmra.mrb[4].mxu1 %vm347_vm2, %v290_v17 }
 0x109   : > { %2184 = vmatmul.mubr.msk.f32.vlgmr.msra.gmra.mrb[0].mxu0 %vm347_vm2, %v290_v17  ;;  %783 = vmatprep.subr.mxu0 %v288_v1 }
 0x10a   : > { %2239 = vmatprep.subr.mxu1 %v2644_v0  ;;  %784 = vmatpush1.msra.mxu0 %v287_v2 }
 0x10b   : > { %2240 = vmatpush3.msra.mxu1 %v289_v3  ;;  %2241 = vmatprep.mubr.msk.f32.mxu1 %vm2645_vm0, %v2644_v0 }
 0x10c   : > { %847 = vmatprep.mubr.f32.mxu0 %v2644_v0  ;;  %2242 = vmatmul.mubr.msk.f32.vlgmr.msra.gmra.mrb[2].mxu1 %vm347_vm2, %v296_v20 }
 0x10d   : > { %937 = vmatprep.subr.mxu0 %v931_v21  ;;  %2186 = vmatmul.mubr.msk.f32.vlgmr.msra.gmra.mrb[2].mxu0 %vm347_vm2, %v296_v20 }
 0x10e   : > { %938 = vmatpush1.msra.mxu0 %v932_v22  ;;  %2244 = vmatprep.subr.mxu1 %v2644_v0 }
 0x10f   : > { %2245 = vmatpush3.msra.mxu1 %v933_v23  ;;  %1081 = vmatprep.subr.mxu0 %v931_v21 }
 0x110   : > { %2246 = vmatprep.mubr.msk.f32.mxu1 %vm2645_vm0, %v2644_v0  ;;  %2249 = vmatprep.subr.mxu1 %v2644_v0 }
 0x111   : > { %1001 = vmatprep.mubr.f32.mxu0 %v2644_v0  ;;  %2247 = vmatmul.mubr.msk.f32.vlgmr.msra.gmra.mrb[6].mxu1 %vm347_vm2, %v292_v24 }
 0x112   : > { %2250 = vmatpush3.msra.mxu1 %v933_v23  ;;  %2188 = vmatmul.mubr.msk.f32.vlgmr.msra.gmra.mrb[0].mxu0 %vm347_vm2, %v292_v24  ;;  %v1231_v30 = vpop.permute.xlu0 %1230 }
 0x113   : > { %1082 = vmatpush1.msra.mxu0 %v932_v22  ;;  %1145 = vmatprep.mubr.f32.mxu0 %v2644_v0 }
 0x114   : > { %2251 = vmatprep.mubr.msk.f32.mxu1 %vm2645_vm0, %v2644_v0  ;;  %2254 = vmatprep.subr.mxu1 %v2644_v0 }
 0x1d3   : > { %v488_v25 = vpop.f32.mrb[0].mxu1 }
 0x1d4   : > { %v2228_v26 = vpop.f32.mrb[1].mxu1 }
 0x1db   : > { %v776_v27 = vpop.f32.mrb[4].mxu1 }
 0x1dc   : > { %v777_v28 = vadd.f32 %v776_v27, %v488_v25  ;;  %v2238_v29 = vpop.f32.mrb[5].mxu1 }
 0x1e4   : > { %v1074_v31 = vpop.f32.mrb[6].mxu1 }
 0x1e5   : > { %v1224_v32 = vadd.f32 %v1074_v31, %v777_v28  ;;  %v1003_v33 = vpop.f32.mrb[0].mxu0  ;;  %v2248_v34 = vpop.f32.mrb[7].mxu1 }
 0x1e6   : > { %v2960_v35 = vadd.f32 %v1231_v30, %v1003_v33  ;;  %v1005_v36 = vpop.f32.mrb[1].mxu0 }
 0x1e7   : > { %v2962_v37 = vadd.f32 %v1231_v30, %v1005_v36  ;;  %v2970_v41 = vadd.f32 %v1231_v30, %v1224_v32 }
 0x1e8   : > { %v1245_v38 = vsel %vm307_vm4, %v2960_v35, 0.0 }
 0x1e9   : > { %1246 = vadd.xlane.f32.xlu1 %v1245_v38  ;;  %v1255_v39 = vmul.f32 %v1245_v38, %v1245_v38  ;;  %v1294_v40 = vsel %vm307_vm4, %v2962_v37, 0.0  ;;  %v1343_v43 = vsel %vm307_vm4, %v2970_v41, 0.0 }
 0x1ea   : > { %v1304_v42 = vmul.f32 %v1294_v40, %v1294_v40  ;;  %v1353_v44 = vmul.f32 %v1343_v43, %v1343_v43 }
 0x1eb   : > { %1256 = vadd.xlane.f32.xlu0 %v1255_v39 }
 0x1ed   : > { %1295 = vadd.xlane.f32.xlu1 %v1294_v40 }
 0x1ef   : > { %1305 = vadd.xlane.f32.xlu0 %v1304_v42 }
 0x1f1   : > { %1344 = vadd.xlane.f32.xlu1 %v1343_v43 }
 0x1f3   : > { %1354 = vadd.xlane.f32.xlu0 %v1353_v44 }
 0x202   : > { %1399 = vperm.xlu1 %2430, %v2915_v4  }
 0x209   : > { %1406 = vperm.xlu0 %2431, %v2915_v4  }
 0x276   : > { %v1247_v47 = vpop.xlane.xlu1 %1246 }
 0x277   : > { %v1248_v48 = vrot.slane %v1247_v47, 4 }
 0x278   : > { %v1257_v49 = vpop.xlane.xlu0 %1256 }
 0x279   : > { %v1249_v50 = vadd.f32 %v1248_v48, %v1247_v47  ;;  %v1258_v51 = vrot.slane %v1257_v49, 4  ;;  %v298_v47 = vld [vmem:[#allocation8 + $0x10] sm:$0xff] }
 0x27a   : > { %v1296_v61 = vpop.xlane.xlu1 %1295  ;;  %2190 = vmatmul.mubr.msk.f32.vlgmr.msra.gmra.mrb[2].mxu0 %vm347_vm2, %v298_v47  ;;  %2252 = vmatmul.mubr.msk.f32.vlgmr.msra.gmra.mrb[2].mxu1 %vm347_vm2, %v298_v47 }
 0x27b   : > { %v1250_v52 = vrot.slane %v1249_v50, 2  ;;  %v1259_v53 = vadd.f32 %v1258_v51, %v1257_v49  ;;  %v1297_v63 = vrot.slane %v1296_v61, 4  ;;  %1507 = vmatprep.mubr.f32.mxu0 %v2644_v0  ;;  %2256 = vmatprep.mubr.msk.f32.mxu1 %vm2645_vm0, %v2644_v0 }
 0x27c   : > { %v1306_v62 = vpop.xlane.xlu0 %1305 }
 0x27d   : > { %v1260_v54 = vrot.slane %v1259_v53, 2  ;;  %v1251_v55 = vadd.f32 %v1250_v52, %v1249_v50  ;;  %v1307_v1 = vrot.slane %v1306_v62, 4  ;;  %v1298_v2 = vadd.f32 %v1297_v63, %v1296_v61 }
 0x27e   : > { %v1345_v16 = vpop.xlane.xlu1 %1344 }
 0x27f   : > { %v1252_v56 = vrot.slane %v1251_v55, 1  ;;  %v1261_v57 = vadd.f32 %v1260_v54, %v1259_v53  ;;  %v1308_v3 = vadd.f32 %v1307_v1, %v1306_v62  ;;  %v1299_v5 = vrot.slane %v1298_v2, 2 }
 0x280   : > { %v1355_v18 = vpop.xlane.xlu0 %1354  ;;  %v1346_v22 = vrot.slane %v1345_v16, 4  ;;  %v303_v62 = vadd.s32 256, %v2918_v7 }
 0x281   : > { %v1253_v58 = vadd.f32 %v1252_v56, %v1251_v55  ;;  %v1262_v59 = vrot.slane %v1261_v57, 1  ;;  %v1309_v6 = vrot.slane %v1308_v3, 2  ;;  %v1300_v9 = vadd.f32 %v1299_v5, %v1298_v2 }
 0x282   : > { %v2979_v21 = vpop.permute.xlu1 %1399  ;;  %v1356_v24 = vrot.slane %v1355_v18, 4  ;;  %v1347_v27 = vadd.f32 %v1346_v22, %v1345_v16  ;;  %vm330_vm8 = vcmp.lt.s32.totalorder %v303_v62, 272  ;;  %v2653_v5 = vmov 4   ;;  %v294_v16 = vld [vmem:[#allocation7 + $0x8] sm:$0xff] }
 0x283   : > { %2301 = vpush %v1253_v58  ;;  %v1263_v60 = vadd.f32 %v1262_v59, %v1261_v57  ;;  %v1310_v10 = vadd.f32 %v1309_v6, %v1308_v3  ;;  %v1301_v11 = vrot.slane %v1300_v9, 1  ;;  %2432 = vset.pattern.permute.xlu1 %v2653_v5 }
 0x284   : > { %v1357_v29 = vadd.f32 %v1356_v24, %v1355_v18  ;;  %v1348_v31 = vrot.slane %v1347_v27, 2 }
 0x285   : > { %2303 = vpush %v1263_v60  ;;  %v1311_v12 = vrot.slane %v1310_v10, 1  ;;  %v1302_v14 = vadd.f32 %v1301_v11, %v1300_v9  ;;  %v293_v11 = vld [vmem:[#allocation7] sm:$0xff] }
 0x286   : > { %v1358_v33 = vrot.slane %v1357_v29, 2  ;;  %v1349_v36 = vadd.f32 %v1348_v31, %v1347_v27 }
 0x287   : > { %v1312_v15 = vadd.f32 %v1311_v12, %v1310_v10 }
 0x288   : > { %v2983_v25 = vpop.permute.xlu0 %1406  ;;  %v1359_v38 = vadd.f32 %v1358_v33, %v1357_v29  ;;  %v1350_v39 = vrot.slane %v1349_v36, 1 }
 0x28a   : > { %v1360_v40 = vrot.slane %v1359_v38, 1  ;;  %v1351_v43 = vadd.f32 %v1350_v39, %v1349_v36 }
 0x28c   : > { %v1361_v44 = vadd.f32 %v1360_v40, %v1359_v38  ;;  %v2655_v40 = vmov 5  }
 0x2b4   : > { %s2302_s15 = spop %2301 }
 0x2b5   : > { %s1265_s16 = smul.f32 0.0078125, %s2302_s15 }
 0x2b6   : > { %s2304_s27 = spop %2303 }
 0x2b7   : > { %s1267_s10 = smul.f32 %s1265_s16, %s1265_s16  ;;  %v1280_v17 = vstv %s1265_s16 }
 0x2b8   : > { %s1266_s9 = smul.f32 0.0078125, %s2304_s27  ;;  %v1392_v19 = vsub.f32 %v2960_v35, %v1280_v17 }
 0x2ba   : > { %s1268_s8 = ssub.f32 %s1266_s9, %s1267_s10 }
 0x2bc   : > { %s1269_s13 = smax.f32 %s2651_s11, %s1268_s8  ;;  %s2652_s8 = smov 1  }
 0x2bd   : > { %s1270_s29 = sadd.f32 1e-05, %s1269_s13 }
 0x2bf   : > { %v1271_v8 = vstv %s1270_s29 }
 0x2c0   : > { %2436 = vrsqrt.f32 %v1271_v8 }
 0x2ca   : > { %v2437_v13 = vpop.eup %2436 }
 0x2cb   : > { %2305 = vpush %v2437_v13 }
 0x2cc   : > { %2307 = vpush %v1302_v14 }
 0x2cd   : > { %2309 = vpush %v1312_v15 }
 0x2fc   : > { %s2306_s17 = spop %2305 }
 0x2fd   : > { %v1287_v20 = vstv %s2306_s17  ;;  %s2308_s26 = spop %2307 }
 0x2fe   : > { %v1395_v23 = vmul.f32 %v1392_v19, %v1287_v20  ;;  %s2981_s23 = smul.f32 0.0078125, %s2308_s26  ;;  %s2310_s12 = spop %2309 }
 0x2ff   : > { %s1315_s15 = smul.f32 0.0078125, %s2310_s12 }
 0x300   : > { %s1316_s16 = smul.f32 %s2981_s23, %s2981_s23  ;;  %v1402_v26 = vmul.f32 %v2979_v21, %v1395_v23  ;;  %v1329_v45 = vstv %s2981_s23 }
 0x301   : > { %v1393_v46 = vsub.f32 %v2962_v37, %v1329_v45  ;;  %v302_v37 = vadd.s32 128, %v2918_v7 }
 0x302   : > { %s1317_s10 = ssub.f32 %s1315_s15, %s1316_s16  ;;  %v1409_v28 = vadd.f32 %v2983_v25, %v1402_v26 }
 0x303   : > { %vm317_vm6 = vcmp.lt.s32.totalorder %v302_v37, 144 }
 0x304   : > { %s1318_s27 = smax.f32 %s2651_s11, %s1317_s10  ;;  %vm1412_vm5 = vcmp.gt.f32.partialorder %v1409_v28, 0.0  ;;  %v1415_v30 = vmul.f32 0.01, %v1409_v28 }
 0x305   : > { %s1319_s9 = sadd.f32 1e-05, %s1318_s27 }
 0x306   : > { %v2990_v32 = vsel %vm1412_vm5, %v1409_v28, %v1415_v30 }
 0x307   : > { %v1320_v34 = vstv %s1319_s9  ;;  %v1427_v35 = vsel %vm307_vm4, %v2990_v32, 0.0 }
 0x308   : > { %2438 = vrsqrt.f32 %v1320_v34  ;;  %1430 = vrot.lane.b32.xlu1 %v1427_v35, %s2652_s8 }
 0x312   : > { %v2439_v42 = vpop.eup %2438 }
 0x313   : > { %2311 = vpush %v2439_v42  ;;  %v2656_v42 = vmov 6  }
 0x314   : > { %2313 = vpush %v1351_v43  ;;  %2435 = vset.pattern.permute.xlu0 %v2656_v42 }
 0x315   : > { %2315 = vpush %v1361_v44 }
 0x344   : > { %s2312_s13 = spop %2311 }
 0x345   : > { %v1336_v48 = vstv %s2312_s13  ;;  %s2314_s29 = spop %2313 }
 0x346   : > { %v1396_v49 = vmul.f32 %v1393_v46, %v1336_v48  ;;  %s1363_s17 = smul.f32 0.0078125, %s2314_s29  ;;  %s2316_s26 = spop %2315 }
 0x347   : > { %s1364_s12 = smul.f32 0.0078125, %s2316_s26 }
 0x348   : > { %v1403_v50 = vmul.f32 %v2979_v21, %v1396_v49  ;;  %s1365_s23 = smul.f32 %s1363_s17, %s1363_s17  ;;  %v1378_v57 = vstv %s1363_s17 }
 0x349   : > { %v1394_v58 = vsub.f32 %v2970_v41, %v1378_v57  ;;  %v2654_v41 = vmov 3  }
 0x34a   : > { %v1410_v51 = vadd.f32 %v2983_v25, %v1403_v50  ;;  %s1366_s15 = ssub.f32 %s1364_s12, %s1365_s23 }
 0x34c   : > { %s1367_s16 = smax.f32 %s2651_s11, %s1366_s15  ;;  %vm1413_vm7 = vcmp.gt.f32.partialorder %v1410_v51, 0.0  ;;  %v1416_v52 = vmul.f32 0.01, %v1410_v51 }
 0x34d   : > { %s1368_s10 = sadd.f32 1e-05, %s1367_s16 }
 0x34e   : > { %v1419_v53 = vsel %vm1413_vm7, %v1410_v51, %v1416_v52 }
 0x34f   : > { %v1369_v54 = vstv %s1368_s10  ;;  %v1428_v55 = vsel %vm317_vm6, %v1419_v53, 0.0 }
 0x350   : > { %2440 = vrsqrt.f32 %v1369_v54  ;;  %1432 = vrot.lane.b32.xlu1 %v1428_v55, %s2652_s8 }
 0x35a   : > { %v2441_v56 = vpop.eup %2440 }
 0x35b   : > { %2317 = vpush %v2441_v56 }
 0x37a   : > { %v1431_v6 = vpop.permute.xlu1 %1430 }
 0x38c   : > { %s2318_s27 = spop %2317 }
 0x38d   : > { %v1385_v59 = vstv %s2318_s27 }
 0x38e   : > { %v1397_v60 = vmul.f32 %v1394_v58, %v1385_v59 }
 0x390   : > { %v1404_v61 = vmul.f32 %v2979_v21, %v1397_v60  ;;  %v295_v21 = vld [vmem:[#allocation7 + $0x10] sm:$0xff] }
 0x392   : > { %v1411_v63 = vadd.f32 %v2983_v25, %v1404_v61 }
 0x394   : > { %vm1414_vm9 = vcmp.gt.f32.partialorder %v1411_v63, 0.0  ;;  %v1417_v1 = vmul.f32 0.01, %v1411_v63 }
 0x396   : > { %v1420_v2 = vsel %vm1414_vm9, %v1411_v63, %v1417_v1 }
 0x397   : > { %v1429_v3 = vsel %vm330_vm8, %v1420_v2, 0.0 }
 0x398   : > { %1434 = vrot.lane.b32.xlu1 %v1429_v3, %s2652_s8 }
 0x39c   : > { %1730 = vrot.lane.b32.xlu1 %v1428_v55, %s2646_s24 }
 0x3a0   : > { %1732 = vrot.lane.b32.xlu1 %v1429_v3, %s2646_s24 }
 0x3a4   : > { %1728 = vrot.lane.b32.xlu1 %v1427_v35, %s2646_s24 }
 0x3a8   : > { %1237 = vperm.xlu1 %2432, %v2915_v4  }
 0x3ac   : > { %2433 = vset.pattern.permute.xlu1 %v2654_v41 }
 0x3ad   : > { %1885 = vperm.xlu1 %2433, %v2915_v4  }
 0x3b1   : > { %2434 = vset.pattern.permute.xlu1 %v2655_v40 }
 0x3c2   : > { %v1433_v8 = vpop.permute.xlu1 %1432 }
 0x3c3   : > { %v1438_v9 = vsel %vm1436_vm10, %v1431_v6, %v1433_v8 }
 0x3c4   : > { %1443 = vmatprep.subr.mxu0 %v1438_v9 }
 0x40a   : > { %v1435_v10 = vpop.permute.xlu1 %1434 }
 0x40b   : > { %v1437_v12 = vsel %vm1436_vm10, %v1433_v8, %v1435_v10  ;;  %v1439_v13 = vsel %vm1436_vm10, %v1435_v10, %v1431_v6 }
 0x40c   : > { %1444 = vmatpush1.msra.mxu0 %v1439_v13  ;;  %2255 = vmatpush3.msra.mxu1 %v1437_v12 }
 0x40d   : > { %2192 = vmatmul.mubr.msk.f32.vlgmr.msra.gmra.mrb[2].mxu0 %vm347_vm2, %v293_v11  ;;  %2257 = vmatmul.mubr.msk.f32.vlgmr.msra.gmra.mrb[2].mxu1 %vm347_vm2, %v293_v11 }
 0x40e   : > { %2194 = vmatprep.subr.msk.mxu0 %vm317_vm6, %v1419_v53  ;;  %2259 = vmatprep.subr.mxu1 %v2644_v0  ;;  %v1731_v14 = vpop.permute.xlu1 %1730 }
 0x40f   : > { %2195 = vmatpush1.msk.msra.mxu0 %vm307_vm4, %v2990_v32  ;;  %2260 = vmatpush3.msk.msra.mxu1 %vm330_vm8, %v1420_v2 }
 0x410   : > { %1651 = vmatprep.mubr.f32.mxu0 %v2644_v0  ;;  %2261 = vmatprep.mubr.msk.f32.mxu1 %vm2645_vm0, %v2644_v0 }
 0x411   : > { %2264 = vmatprep.subr.mxu1 %v2644_v0 }
 0x412   : > { %v1733_v15 = vpop.permute.xlu1 %1732 }
 0x413   : > { %v1734_v17 = vsel %vm343_vm1, %v1731_v14, %v1733_v15 }
 0x414   : > { %1740 = vmatprep.subr.mxu0 %v1734_v17 }
 0x415   : > { %2196 = vmatmul.mubr.msk.f32.vlgmr.msra.gmra.mrb[2].mxu0 %vm347_vm2, %v294_v16  ;;  %2262 = vmatmul.mubr.msk.f32.vlgmr.msra.gmra.mrb[2].mxu1 %vm347_vm2, %v294_v16 }
 0x416   : > { %v1729_v18 = vpop.permute.xlu1 %1728  ;;  %1804 = vmatprep.mubr.f32.mxu0 %v2644_v0  ;;  %2266 = vmatprep.mubr.msk.f32.mxu1 %vm2645_vm0, %v2644_v0 }
 0x417   : > { %v1735_v19 = vsel %vm343_vm1, %v1729_v18, %v1731_v14  ;;  %v1736_v20 = vsel %vm343_vm1, %v1733_v15, %v1729_v18 }
 0x418   : > { %1741 = vmatpush1.msra.mxu0 %v1735_v19  ;;  %2265 = vmatpush3.msra.mxu1 %v1736_v20 }
 0x41d   : > { %2199 = vmatmul.mubr.msk.f32.vlgmr.msra.gmra.mrb[2].mxu0 %vm347_vm2, %v295_v21  ;;  %2267 = vmatmul.mubr.msk.f32.vlgmr.msra.gmra.mrb[2].mxu1 %vm347_vm2, %v295_v21 }
 0x427   : > { %v1238_v22 = vpop.permute.xlu1 %1237 }
 0x42c   : > { %v1886_v23 = vpop.permute.xlu1 %1885 }
 0x4f0   : > { %v1806_v24 = vpop.f32.mrb[2].mxu0  ;;  %v1877_v25 = vpop.f32.mrb[2].mxu1 }
 0x4f1   : > { %v2269_v26 = vadd.f32 %v1806_v24, %v1238_v22  ;;  %v1808_v27 = vpop.f32.mrb[3].mxu0  ;;  %v2268_v0 = vpop.f32.mrb[3].mxu1  ;;  %v2273_v29 = vadd.f32 %v1877_v25, %v1238_v22 }
 0x4f2   : > { %v2271_v28 = vadd.f32 %v1808_v27, %v1238_v22 }
 0x4f3   : > { %v3046_v30 = vadd.f32 %v2269_v26, %v1886_v23  ;;  %v3053_v34 = vadd.f32 %v2273_v29, %v1886_v23 }
 0x4f4   : > { %v3051_v32 = vadd.f32 %v2271_v28, %v1886_v23 }
 0x4f5   : > { %v1894_v31 = vsel %vm307_vm4, %v3046_v30, 0.0  ;;  %v1980_v36 = vsel %vm307_vm4, %v3053_v34, 0.0 }
 0x4f6   : > { %1895 = vadd.xlane.f32.xlu0 %v1894_v31  ;;  %v1904_v33 = vmul.f32 %v1894_v31, %v1894_v31  ;;  %v1937_v35 = vsel %vm307_vm4, %v3051_v32, 0.0  ;;  %v1990_v39 = vmul.f32 %v1980_v36, %v1980_v36 }
 0x4f7   : > { %v1947_v38 = vmul.f32 %v1937_v35, %v1937_v35 }
 0x4f8   : > { %1905 = vadd.xlane.f32.xlu1 %v1904_v33 }
 0x4fa   : > { %1938 = vadd.xlane.f32.xlu0 %v1937_v35 }
 0x4fc   : > { %1981 = vadd.xlane.f32.xlu1 %v1980_v36 }
 0x4fe   : > { %1948 = vadd.xlane.f32.xlu0 %v1947_v38 }
 0x502   : > { %1991 = vadd.xlane.f32.xlu0 %v1990_v39 }
 0x50d   : > { %2030 = vperm.xlu1 %2434, %v2915_v4  }
 0x518   : > { %2037 = vperm.xlu0 %2435, %v2915_v4  }
 0x583   : > { %v1896_v43 = vpop.xlane.xlu0 %1895 }
 0x584   : > { %v1897_v44 = vrot.slane %v1896_v43, 4 }
 0x585   : > { %v1906_v45 = vpop.xlane.xlu1 %1905 }
 0x586   : > { %v1898_v46 = vadd.f32 %v1897_v44, %v1896_v43  ;;  %v1907_v47 = vrot.slane %v1906_v45, 4 }
 0x587   : > { %v1939_v55 = vpop.xlane.xlu0 %1938 }
 0x588   : > { %v1899_v7 = vrot.slane %v1898_v46, 2  ;;  %v1908_v48 = vadd.f32 %v1907_v47, %v1906_v45  ;;  %v1940_v4 = vrot.slane %v1939_v55, 4 }
 0x589   : > { %v1982_v8 = vpop.xlane.xlu1 %1981 }
 0x58a   : > { %v1909_v49 = vrot.slane %v1908_v48, 2  ;;  %v1900_v50 = vadd.f32 %v1899_v7, %v1898_v46  ;;  %v1941_v58 = vadd.f32 %v1940_v4, %v1939_v55  ;;  %v1983_v14 = vrot.slane %v1982_v8, 4 }
 0x58b   : > { %v1949_v56 = vpop.xlane.xlu0 %1948 }
 0x58c   : > { %v1901_v37 = vrot.slane %v1900_v50, 1  ;;  %v1910_v51 = vadd.f32 %v1909_v49, %v1908_v48  ;;  %v1950_v57 = vrot.slane %v1949_v56, 4  ;;  %v1942_v60 = vrot.slane %v1941_v58, 2 }
 0x58d   : > { %v3065_v13 = vpop.permute.xlu1 %2030  ;;  %v1984_v19 = vadd.f32 %v1983_v14, %v1982_v8 }
 0x58e   : > { %v1902_v52 = vadd.f32 %v1901_v37, %v1900_v50  ;;  %v1911_v53 = vrot.slane %v1910_v51, 1  ;;  %v1951_v59 = vadd.f32 %v1950_v57, %v1949_v56  ;;  %v1943_v63 = vadd.f32 %v1942_v60, %v1941_v58 }
 0x58f   : > { %v1992_v10 = vpop.xlane.xlu0 %1991  ;;  %v1985_v23 = vrot.slane %v1984_v19, 2 }
 0x590   : > { %2319 = vpush %v1902_v52  ;;  %v1912_v54 = vadd.f32 %v1911_v53, %v1910_v51  ;;  %v1952_v61 = vrot.slane %v1951_v59, 2  ;;  %v1944_v2 = vrot.slane %v1943_v63, 1  ;;  %v1993_v16 = vrot.slane %v1992_v10, 4 }
 0x591   : > { %v1986_v27 = vadd.f32 %v1985_v23, %v1984_v19 }
 0x592   : > { %2321 = vpush %v1912_v54  ;;  %v1953_v1 = vadd.f32 %v1952_v61, %v1951_v59  ;;  %v1945_v41 = vadd.f32 %v1944_v2, %v1943_v63  ;;  %v1994_v21 = vadd.f32 %v1993_v16, %v1992_v10 }
 0x593   : > { %v1987_v28 = vrot.slane %v1986_v27, 1 }
 0x594   : > { %v1954_v3 = vrot.slane %v1953_v1, 1  ;;  %v1995_v25 = vrot.slane %v1994_v21, 2 }
 0x595   : > { %v1988_v31 = vadd.f32 %v1987_v28, %v1986_v27 }
 0x596   : > { %v1955_v6 = vadd.f32 %v1954_v3, %v1953_v1  ;;  %v1996_v0 = vadd.f32 %v1995_v25, %v1994_v21 }
 0x597   : > { %v2038_v17 = vpop.permute.xlu0 %2037 }
 0x598   : > { %v1997_v29 = vrot.slane %v1996_v0, 1 }
 0x59a   : > { %v1998_v33 = vadd.f32 %v1997_v29, %v1996_v0 }
 0x5c1   : > { %s2320_s24 = spop %2319 }
 0x5c2   : > { %s1914_s9 = smul.f32 0.0078125, %s2320_s24 }
 0x5c3   : > { %s2322_s13 = spop %2321 }
 0x5c4   : > { %s1916_s8 = smul.f32 %s1914_s9, %s1914_s9  ;;  %v1923_v9 = vstv %s1914_s9 }
 0x5c5   : > { %s1915_s29 = smul.f32 0.0078125, %s2322_s13  ;;  %v2023_v11 = vsub.f32 %v3046_v30, %v1923_v9 }
 0x5c7   : > { %s1917_s17 = ssub.f32 %s1915_s29, %s1916_s8  ;;  %s3075_s29 = scalar_lea.vmem [#allocation10], %s2300_s28 }
 0x5c9   : > { %s1918_s26 = smax.f32 %s2651_s11, %s1917_s17 }
 0x5ca   : > { %s1919_s12 = sadd.f32 1e-05, %s1918_s26 }
 0x5cc   : > { %v1920_v62 = vstv %s1919_s12 }
 0x5cd   : > { %2442 = vrsqrt.f32 %v1920_v62 }
 0x5d7   : > { %v2443_v5 = vpop.eup %2442 }
 0x5d8   : > { %2323 = vpush %v2443_v5 }
 0x5d9   : > { %2325 = vpush %v1945_v41 }
 0x5da   : > { %2327 = vpush %v1955_v6 }
 0x609   : > { %s2324_s23 = spop %2323 }
 0x60a   : > { %v1930_v12 = vstv %s2324_s23  ;;  %s2326_s15 = spop %2325 }
 0x60b   : > { %v2026_v15 = vmul.f32 %v2023_v11, %v1930_v12  ;;  %s3067_s16 = smul.f32 0.0078125, %s2326_s15  ;;  %s2328_s10 = spop %2327 }
 0x60c   : > { %s1958_s27 = smul.f32 0.0078125, %s2328_s10 }
 0x60d   : > { %s1959_s24 = smul.f32 %s3067_s16, %s3067_s16  ;;  %v2033_v18 = vmul.f32 %v3065_v13, %v2026_v15  ;;  %v1966_v35 = vstv %s3067_s16 }
 0x60e   : > { %v2024_v36 = vsub.f32 %v3051_v32, %v1966_v35 }
 0x60f   : > { %s1960_s9 = ssub.f32 %s1958_s27, %s1959_s24  ;;  %v2040_v20 = vadd.f32 %v2038_v17, %v2033_v18 }
 0x611   : > { %s1961_s8 = smax.f32 %s2651_s11, %s1960_s9  ;;  %vm2043_vm11 = vcmp.gt.f32.partialorder %v2040_v20, 0.0  ;;  %v2046_v22 = vmul.f32 0.01, %v2040_v20  ;;  %s2070_s9 = sshll.u32 %s3075_s29, 4  ;;  %s3092_s9 = int_to_ptr.vmem [resolvable:$true] %s2070_s9 }
 0x612   : > { %s1962_s13 = sadd.f32 1e-05, %s1961_s8 }
 0x613   : > { %v2049_v24 = vsel %vm2043_vm11, %v2040_v20, %v2046_v22 }
 0x614   : > { %v1963_v26 = vstv %s1962_s13  ;;  %2052 = vst [vmem:[%s3075_s29] sm:$0xff] %v2049_v24 }
 0x615   : > { %2444 = vrsqrt.f32 %v1963_v26 }
 0x61f   : > { %v2445_v30 = vpop.eup %2444 }
 0x620   : > { %2329 = vpush %v2445_v30 }
 0x621   : > { %2331 = vpush %v1988_v31 }
 0x622   : > { %2333 = vpush %v1998_v33 }
 0x651   : > { %s2330_s17 = spop %2329 }
 0x652   : > { %v1973_v38 = vstv %s2330_s17  ;;  %s2332_s28 = spop %2331 }
 0x653   : > { %v2027_v39 = vmul.f32 %v2024_v36, %v1973_v38  ;;  %s2000_s26 = smul.f32 0.0078125, %s2332_s28  ;;  %s2334_s12 = spop %2333 }
 0x654   : > { %s2001_s23 = smul.f32 0.0078125, %s2334_s12  ;;  %s2056_s28 = scalar_lea.sflag [#allocation4], %s2887_s6 }
 0x655   : > { %v2034_v40 = vmul.f32 %v3065_v13, %v2027_v39  ;;  %s2002_s15 = smul.f32 %s2000_s26, %s2000_s26  ;;  %v2009_v46 = vstv %s2000_s26  ;;  %s2562_s26 = scalar_lea.vmem %s3092_s9, 384 }
 0x656   : > { %v2025_v47 = vsub.f32 %v3053_v34, %v2009_v46  ;;  %p2563_p10 = scmp.ne.s32.totalorder %s3092_s9, %s2562_s26 }
 0x657   : > { %v2041_v42 = vadd.f32 %v2038_v17, %v2034_v40  ;;  %s2003_s10 = ssub.f32 %s2001_s23, %s2002_s15 }
 0x658   : > { %p2564_p3 = pnand %p2563_p10, %p2842_p5 }
 0x659   : > { %vm2044_vm12 = vcmp.gt.f32.partialorder %v2041_v42, 0.0  ;;  %v2047_v43 = vmul.f32 0.01, %v2041_v42  ;;  %s2004_s16 = smax.f32 %s2651_s11, %s2003_s10  ;;  %s2205_s11 = smul.u32 384, %s2709_s22 }
 0x65a   : > { %s2005_s27 = sadd.f32 1e-05, %s2004_s16  ;;  %p2565_p7 = pneg %p2564_p3 }
 0x65b   : > { %v2050_v32 = vsel %vm2044_vm12, %v2041_v42, %v2047_v43  ;;  %s3090_s17 = scalar_lea.hbm %s3140_s5, %s2205_s11  ;;  %s2657_s22 = smov [#allocation10]  }
 0x65c   : > { %2053 = vst [vmem:[%s3075_s29 + $0x8] sm:$0xff] %v2050_v32  ;;  %v2006_v44 = vstv %s2005_s27  ;;  %s2566_s12 = sshll.u32 %s2657_s22, 4  ;;  %s2567_s12 = int_to_ptr.vmem [resolvable:$false] %s2566_s12 }
 0x65d   : > { %2446 = vrsqrt.f32 %v2006_v44  ;;  %s2568_s23 = scalar_lea.vmem %s2567_s12, 768  ;;  %p2569_p12 = scmp.lt.s32.totalorder %s3092_s9, %s2567_s12 }
 0x65e   : > { %p2570_p1 = scmp.lt.s32.totalorder %s2568_s23, %s2562_s26 }
 0x660   : > { %p2571_p2 = por %p2570_p1, %p2569_p12 }
 0x662   : > { %p2572_p4 = pnand %p2571_p2, %p2565_p7 }
 0x667   : > { %v2447_v45 = vpop.eup %2446 }
 0x668   : > { %2335 = vpush %v2447_v45 }
 0x699   : > { %s2336_s24 = spop %2335 }
 0x69a   : > { %v2016_v7 = vstv %s2336_s24 }
 0x69b   : > { %v2028_v48 = vmul.f32 %v2025_v47, %v2016_v7 }
 0x69d   : > { %v2035_v49 = vmul.f32 %v3065_v13, %v2028_v48 }
 0x69f   : > { %v2042_v50 = vadd.f32 %v2038_v17, %v2035_v49 }
 0x6a1   : > { %vm2045_vm13 = vcmp.gt.f32.partialorder %v2042_v50, 0.0  ;;  %v2048_v37 = vmul.f32 0.01, %v2042_v50 }
 0x6a3   : > { %v2051_v34 = vsel %vm2045_vm13, %v2042_v50, %v2048_v37 }
 0x6a4   : > { %2054 = vst [vmem:[%s3075_s29 + $0x10] sm:$0xff] %v2051_v34 }
 0x6a5   : > { %2575 = shalt.err (!%p2572_p4)
}
 0x6a6   : > { %s2576_s6 = scalar_lea.hbm %s3090_s17, 384  ;;  %s2580_s10 = scalar_lea.hbm %s3140_s5, 768 }
 0x6a7   : > { %p2577_p0 = scmp.ne.s32.totalorder %s3090_s17, %s2576_s6  ;;  %p2581_p8 = scmp.lt.u32.totalorder %s3090_s17, %s3140_s5 }
 0x6a8   : > { %p2582_p13 = scmp.lt.u32.totalorder %s2580_s10, %s2576_s6  ;;  %p2584_p10 = scmp.lt.u32.totalorder %s2576_s6, %s3090_s17 }
 0x6a9   : > { %p2578_p9 = pnand %p2577_p0, %p2842_p5 }
 0x6aa   : > { %p2583_p6 = por %p2582_p13, %p2581_p8 }
 0x6ab   : > { %p2579_p11 = pneg %p2578_p9 }
 0x6ac   : > { %p2585_p3 = por %p2584_p10, %p2583_p6 }
 0x6ae   : > { %p2586_p7 = pnand %p2585_p3, %p2579_p11 }
 0x6b0   : > { %2589 = shalt.err (!%p2586_p7)
}
 0x6b1   : > { %2351 = dma.vmem_to_hbm [thread:$0]  (%p2842_p5), %s3092_s9, 384, %s3090_s17, %s2056_s28  }
 0x6b2 PF: > { %s2082_s24 = sand.u32 1, %s2624_s18   ;;  %p3158_p12 = scmp.ne.s32.totalorder %s3145_s25, 0 }
 0x6b3   : > { %p3159_p1 = scmp.ge.s32.totalorder %s2636_s21, 2  ;;  %s2083_s11 = scalar_lea.sflag [#allocation4], %s2082_s24 }
 0x6b5   : > { %p2368_p2 = pnand %p3159_p1, %p3158_p12 }
 0x6b7   : > { %2619 = dma.done.wait (!%p2368_p2), %s2083_s11, 384  }
 0x6b8   : > { %2621 = vsyncadd (!%p2368_p2), %s2083_s11, 4294966912  ;;  %p20_p4 = scmp.ge.s32.totalorder %s2828_s14, 4   ;;  %s3160_s18 = smov %s2628_s19 }
 0x6b9   : > { %s3161_s19 = smov %s2632_s20  ;;  %s3162_s20 = smov %s2838_s30 }
 0x6ba   : > { %s3163_s21 = smov %s2828_s14  ;;  %22 = sbr.rel (!%p20_p4) target bundleno = 7 (0x7), region = 97 }
 0x6c1   :  { %2088 = vsyncpa [#allocation3], 1 }
 0x6c2   :  { %2090 = vsyncpa [#allocation3 + $0x1], 1 }
 0x6c3   :  { %2091 = vsyncpa [#allocation6], 1 }
 0x6c4   :  { %2092 = vsyncpa [#allocation9], 1 }
 0x6c5   :  { %2093 = vsyncpa [#allocation4], 1 }
 0x6c6   :  { %2095 = vsyncpa [#allocation4 + $0x1], 1 }

</bundles_post_ra>
